<compile_context>
chip_gen: v6e
topology: v6e:2x2x1
jax: 0.10.0
libtpu: 0.0.40
codegen_flags: <defaults>
</compile_context>

<pallas_src>
import functools

import jax
import jax.numpy as jnp
from jax.experimental import pallas as pl
from jax.experimental.pallas import tpu as pltpu


# ------------------------------ Fused kernel ---------------------------------
def _make_fused_kernel(T, H, num_layers):
    def kernel(*refs):
        x_ref = refs[0]                                   # (T*B, D) bf16, time-major
        layer_refs = refs[1:1 + 3 * num_layers]
        (w1_ref, b1_ref, w2_ref, b2_ref,                  # head params
         o_ref,                                           # (B, out) output
         seq_ref) = refs[1 + 3 * num_layers:]             # (T*B, H) f32 scratch

        B = x_ref.shape[0] // T

        h_last = None
        for l in range(num_layers):
            wih_ref, whh_ref, b_ref = layer_refs[3 * l:3 * (l + 1)]

            if l == 0:
                inp = x_ref[...]                          # already bf16 time-major
            else:
                # previous layer's hidden sequence (inter-layer dropout p=0.2
                # is identity in eval mode); cast once for the MXU
                inp = seq_ref[...].astype(jnp.bfloat16)

            # Hoisted input projection + merged bias:
            # one (T*B, d_in) @ (d_in, 4H) matmul instead of T tiny matmuls.
            gates_x = jnp.dot(inp, wih_ref[...],
                              preferred_element_type=jnp.float32) + b_ref[...]

            h = jnp.zeros((B, H), jnp.float32)
            c = jnp.zeros((B, H), jnp.float32)
            write_seq = (l + 1 < num_layers)

            # Serial recurrence: h/c live in vregs; T is small & static here,
            # so a full unroll keeps LLO scheduler visibility.
            for t in range(T):
                g = gates_x[t * B:(t + 1) * B, :]
                if t > 0:  # h == 0 at t == 0 -> skip the dead matmul
                    g = g + jnp.dot(h.astype(jnp.bfloat16), whh_ref[...],
                                    preferred_element_type=jnp.float32)
                # gate columns are pre-permuted to [i, f, o, g]
                s = jax.nn.sigmoid(g[:, :3 * H])
                i_t = s[:, 0 * H:1 * H]
                f_t = s[:, 1 * H:2 * H]
                o_t = s[:, 2 * H:3 * H]
                g_t = jnp.tanh(g[:, 3 * H:])
                c = f_t * c + i_t * g_t
                h = o_t * jnp.tanh(c)
                if write_seq:
                    # stream h_t straight into the inter-layer scratch
                    # (8-row, sublane-aligned f32 store; no list / concat)
                    seq_ref[t * B:(t + 1) * B, :] = h
            h_last = h                                     # == out[:, -1, :]

        # --- head: BN (eval) pre-folded into fc1; dropout is identity ---------
        z = jnp.dot(h_last.astype(jnp.bfloat16), w1_ref[...],
                    preferred_element_type=jnp.float32) + b1_ref[...]
        z = jnp.maximum(z, 0.0)
        o_ref[...] = (jnp.dot(z.astype(jnp.bfloat16), w2_ref[...],
                              preferred_element_type=jnp.float32) + b2_ref[...])
        # (B=8 / out=4: a single masked store beats padding to 128 lanes.)

    return kernel


# ------------------------------ Model wrapper ---------------------------------
def lstm_model_forward(params, x):
    """x: (B, T, input_size), batch_first like the PyTorch module."""
    B, T, D = x.shape
    H = params["lstm"][0][1].shape[0]          # w_hh: (H, 4H)
    num_layers = len(params["lstm"])
    out_size = params["fc2"][0].shape[1]

    # batch-first -> time-major done in the wrapper (tiny HBM copy, hidden
    # under launch overhead); x only feeds the MXU, so bf16 is safe.
    x_tm = jnp.transpose(x, (1, 0, 2)).reshape(T * B, D).astype(jnp.bfloat16)

    operands = [x_tm]
    for (w_ih, w_hh, b) in params["lstm"]:
        operands += [w_ih, w_hh, b]
    operands += [params["fc1"][0], params["fc1"][1],
                 params["fc2"][0], params["fc2"][1]]

    # Everything (inputs, weights, scratch) is < 100 KiB -> whole arrays live
    # in VMEM; single kernel invocation, no grid.
    vmem = pl.BlockSpec(memory_space=pltpu.MemorySpace.VMEM)
    return pl.pallas_call(
        _make_fused_kernel(T, H, num_layers),
        out_shape=jax.ShapeDtypeStruct((B, out_size), jnp.float32),
        in_specs=[vmem] * len(operands),
        out_specs=vmem,
        scratch_shapes=[pltpu.VMEM((T * B, H), jnp.float32)],
    )(*operands)


# ------------------------------ Initialization --------------------------------
def init_raw_params(key, input_size, hidden_size, num_layers, output_size):
    """Random params mirroring the PyTorch module's default init.

    LSTM weights are stored already transposed to (in_features, 4H) with gate
    columns in PyTorch's [i, f, g, o] order.  Real torch checkpoints
    (weight_ih_l{k}: (4H, in)) must be transposed with .T to match this layout
    before calling prepare_params.
    """
    k = 1.0 / float(hidden_size) ** 0.5
    layers = []
    for l in range(num_layers):
        d_in = input_size if l == 0 else hidden_size
        key, k1, k2, k3, k4 = jax.random.split(key, 5)
        w_ih = jax.random.uniform(k1, (d_in, 4 * hidden_size), jnp.float32, -k, k)
        w_hh = jax.random.uniform(k2, (hidden_size, 4 * hidden_size),
                                  jnp.float32, -k, k)
        b_ih = jax.random.uniform(k3, (4 * hidden_size,), jnp.float32, -k, k)
        b_hh = jax.random.uniform(k4, (4 * hidden_size,), jnp.float32, -k, k)
        layers.append((w_ih, w_hh, b_ih, b_hh))

    bn = {"gamma": jnp.ones((hidden_size,), jnp.float32),
          "beta": jnp.zeros((hidden_size,), jnp.float32),
          "mean": jnp.zeros((hidden_size,), jnp.float32),
          "var": jnp.ones((hidden_size,), jnp.float32),
          "eps": 1e-5}

    key, k5, k6, k7, k8 = jax.random.split(key, 5)
    kf1 = 1.0 / float(hidden_size) ** 0.5
    w1 = jax.random.uniform(k5, (hidden_size, 64), jnp.float32, -kf1, kf1)
    b1 = jax.random.uniform(k6, (64,), jnp.float32, -kf1, kf1)
    kf2 = 1.0 / float(64) ** 0.5
    w2 = jax.random.uniform(k7, (64, output_size), jnp.float32, -kf2, kf2)
    b2 = jax.random.uniform(k8, (output_size,), jnp.float32, -kf2, kf2)
    return {"lstm": layers, "bn": bn, "fc1": (w1, b1), "fc2": (w2, b2)}


def _permute_gate_cols(w):
    """[i, f, g, o] column blocks -> [i, f, o, g] (sigmoid gates contiguous)."""
    i, f, g, o = jnp.split(w, 4, axis=-1)
    return jnp.concatenate([i, f, o, g], axis=-1)


def prepare_params(raw):
    """One-time reparameterization for the fused kernel:
       * combine b_ih + b_hh; permute gate columns [i,f,g,o] -> [i,f,o,g]
         consistently across W_ih, W_hh and the bias
       * fold BatchNorm1d (eval / running stats, eps=1e-5) into fc1
       * cast all matmul weights to bf16 (MXU operands); biases stay f32
    """
    lstm = []
    for (w_ih, w_hh, b_ih, b_hh) in raw["lstm"]:
        b = (b_ih + b_hh).reshape(1, -1)
        lstm.append((_permute_gate_cols(w_ih).astype(jnp.bfloat16),
                     _permute_gate_cols(w_hh).astype(jnp.bfloat16),
                     _permute_gate_cols(b)))

    bn = raw["bn"]
    w1, b1 = raw["fc1"]
    scale = bn["gamma"] / jnp.sqrt(bn["var"] + bn["eps"])       # (H,)
    shift = bn["beta"] - bn["mean"] * scale                     # (H,)
    w1_f = (w1 * scale[:, None]).astype(jnp.bfloat16)           # (H, 64)
    b1_f = (b1 + shift @ w1).reshape(1, -1)                     # (1, 64)

    w2, b2 = raw["fc2"]
    return {"lstm": lstm, "fc1": (w1_f, b1_f),
            "fc2": (w2.astype(jnp.bfloat16), b2.reshape(1, -1))}


# ----------------------------------- Main --------------------------------------
if __name__ == "__main__":
    B, T = 8, 8
    input_size, hidden_size, num_layers, output_size = 16, 32, 2, 4

    key = jax.random.PRNGKey(0)
    key, kx, kp = jax.random.split(key, 3)
    x = jax.random.normal(kx, (B, T, input_size), jnp.float32)
    params = prepare_params(
        init_raw_params(kp, input_size, hidden_size, num_layers, output_size))

    fwd = jax.jit(functools.partial(lstm_model_forward, params))
    out = fwd(x)
    jax.block_until_ready(out)
    assert out.shape == (B, output_size), out.shape
    assert bool(jnp.all(jnp.isfinite(out))), "non-finite output"
    print("KERNEL_OK")
</pallas_src>

<mosaic_0001>
module attributes {stable_mosaic.version = 11 : i64} {
  func.func @kernel(%arg0: memref<64x16xbf16, #tpu.memory_space<vmem>>, %arg1: memref<16x128xbf16, #tpu.memory_space<vmem>>, %arg2: memref<32x128xbf16, #tpu.memory_space<vmem>>, %arg3: memref<1x128xf32, #tpu.memory_space<vmem>>, %arg4: memref<32x128xbf16, #tpu.memory_space<vmem>>, %arg5: memref<32x128xbf16, #tpu.memory_space<vmem>>, %arg6: memref<1x128xf32, #tpu.memory_space<vmem>>, %arg7: memref<32x64xbf16, #tpu.memory_space<vmem>>, %arg8: memref<1x64xf32, #tpu.memory_space<vmem>>, %arg9: memref<64x4xbf16, #tpu.memory_space<vmem>>, %arg10: memref<1x4xf32, #tpu.memory_space<vmem>>, %arg11: memref<8x4xf32, #tpu.memory_space<vmem>>, %arg12: memref<64x32xf32, #tpu.memory_space<vmem>>) attributes {dimension_semantics = [], scalar_prefetch = 0 : i64, scratch_operands = 1 : i64, tpu.core_type = #tpu.core_type<tc>} {
    %c0 = arith.constant 0 : index
    %c0_0 = arith.constant 0 : index
    %0 = vector.load %arg0[%c0, %c0_0] : memref<64x16xbf16, #tpu.memory_space<vmem>>, vector<64x16xbf16>
    %c0_1 = arith.constant 0 : index
    %c0_2 = arith.constant 0 : index
    %1 = vector.load %arg1[%c0_1, %c0_2] : memref<16x128xbf16, #tpu.memory_space<vmem>>, vector<16x128xbf16>
    %cst = arith.constant dense<0.000000e+00> : vector<64x128xf32>
    %2 = tpu.matmul %0, %1, %cst {dimension_numbers = #tpu.dot_dimension_numbers<[1], [0], [0], [1], [0, 0, 1, 1], [], []>} : vector<64x16xbf16>, vector<16x128xbf16>, vector<64x128xf32> -> vector<64x128xf32>
    %c0_3 = arith.constant 0 : index
    %c0_4 = arith.constant 0 : index
    %3 = vector.load %arg3[%c0_3, %c0_4] : memref<1x128xf32, #tpu.memory_space<vmem>>, vector<1x128xf32>
    %4 = vector.broadcast %3 : vector<1x128xf32> to vector<64x128xf32>
    %5 = arith.addf %2, %4 : vector<64x128xf32>
    %cst_5 = arith.constant 0.000000e+00 : f32
    %6 = vector.broadcast %cst_5 : f32 to vector<8x32xf32>
    %7 = vector.extract_strided_slice %5 {offsets = [0, 0], sizes = [8, 128], strides = [1, 1]} : vector<64x128xf32> to vector<8x128xf32>
    %8 = vector.extract_strided_slice %7 {offsets = [0, 0], sizes = [8, 96], strides = [1, 1]} : vector<8x128xf32> to vector<8x96xf32>
    %9 = arith.negf %8 : vector<8x96xf32>
    %10 = math.exp %9 : vector<8x96xf32>
    %cst_6 = arith.constant 1.000000e+00 : f32
    %11 = vector.broadcast %cst_6 : f32 to vector<8x96xf32>
    %12 = arith.addf %11, %10 : vector<8x96xf32>
    %13 = arith.divf %11, %12 : vector<8x96xf32>
    %14 = vector.extract_strided_slice %13 {offsets = [0, 0], sizes = [8, 32], strides = [1, 1]} : vector<8x96xf32> to vector<8x32xf32>
    %15 = vector.extract_strided_slice %13 {offsets = [0, 32], sizes = [8, 32], strides = [1, 1]} : vector<8x96xf32> to vector<8x32xf32>
    %16 = vector.extract_strided_slice %13 {offsets = [0, 64], sizes = [8, 32], strides = [1, 1]} : vector<8x96xf32> to vector<8x32xf32>
    %17 = vector.extract_strided_slice %7 {offsets = [0, 96], sizes = [8, 32], strides = [1, 1]} : vector<8x128xf32> to vector<8x32xf32>
    %18 = math.tanh %17 : vector<8x32xf32>
    %19 = arith.mulf %15, %6 : vector<8x32xf32>
    %20 = arith.mulf %14, %18 : vector<8x32xf32>
    %21 = arith.addf %19, %20 : vector<8x32xf32>
    %22 = math.tanh %21 : vector<8x32xf32>
    %23 = arith.mulf %16, %22 : vector<8x32xf32>
    %c0_7 = arith.constant 0 : index
    %c0_8 = arith.constant 0 : index
    %24 = vector.load %arg12[%c0_7, %c0_8] : memref<64x32xf32, #tpu.memory_space<vmem>>, vector<8x32xf32>
    tpu.vector_store %arg12[%c0_7, %c0_8], %23 {strides = array<i32>} : memref<64x32xf32, #tpu.memory_space<vmem>>, vector<8x32xf32>,
    %25 = vector.extract_strided_slice %5 {offsets = [8, 0], sizes = [8, 128], strides = [1, 1]} : vector<64x128xf32> to vector<8x128xf32>
    %26 = arith.truncf %23 : vector<8x32xf32> to vector<8x32xbf16>
    %c0_9 = arith.constant 0 : index
    %c0_10 = arith.constant 0 : index
    %27 = vector.load %arg2[%c0_9, %c0_10] : memref<32x128xbf16, #tpu.memory_space<vmem>>, vector<32x128xbf16>
    %cst_11 = arith.constant dense<0.000000e+00> : vector<8x128xf32>
    %28 = tpu.matmul %26, %27, %cst_11 {dimension_numbers = #tpu.dot_dimension_numbers<[1], [0], [0], [1], [0, 0, 1, 1], [], []>} : vector<8x32xbf16>, vector<32x128xbf16>, vector<8x128xf32> -> vector<8x128xf32>
    %29 = arith.addf %25, %28 : vector<8x128xf32>
    %30 = vector.extract_strided_slice %29 {offsets = [0, 0], sizes = [8, 96], strides = [1, 1]} : vector<8x128xf32> to vector<8x96xf32>
    %31 = arith.negf %30 : vector<8x96xf32>
    %32 = math.exp %31 : vector<8x96xf32>
    %cst_12 = arith.constant 1.000000e+00 : f32
    %33 = vector.broadcast %cst_12 : f32 to vector<8x96xf32>
    %34 = arith.addf %33, %32 : vector<8x96xf32>
    %35 = arith.divf %33, %34 : vector<8x96xf32>
    %36 = vector.extract_strided_slice %35 {offsets = [0, 0], sizes = [8, 32], strides = [1, 1]} : vector<8x96xf32> to vector<8x32xf32>
    %37 = vector.extract_strided_slice %35 {offsets = [0, 32], sizes = [8, 32], strides = [1, 1]} : vector<8x96xf32> to vector<8x32xf32>
    %38 = vector.extract_strided_slice %35 {offsets = [0, 64], sizes = [8, 32], strides = [1, 1]} : vector<8x96xf32> to vector<8x32xf32>
    %39 = vector.extract_strided_slice %29 {offsets = [0, 96], sizes = [8, 32], strides = [1, 1]} : vector<8x128xf32> to vector<8x32xf32>
    %40 = math.tanh %39 : vector<8x32xf32>
    %41 = arith.mulf %37, %21 : vector<8x32xf32>
    %42 = arith.mulf %36, %40 : vector<8x32xf32>
    %43 = arith.addf %41, %42 : vector<8x32xf32>
    %44 = math.tanh %43 : vector<8x32xf32>
    %45 = arith.mulf %38, %44 : vector<8x32xf32>
    %c8 = arith.constant 8 : index
    %c0_13 = arith.constant 0 : index
    %46 = vector.load %arg12[%c8, %c0_13] : memref<64x32xf32, #tpu.memory_space<vmem>>, vector<8x32xf32>
    tpu.vector_store %arg12[%c8, %c0_13], %45 {strides = array<i32>} : memref<64x32xf32, #tpu.memory_space<vmem>>, vector<8x32xf32>,
    %47 = vector.extract_strided_slice %5 {offsets = [16, 0], sizes = [8, 128], strides = [1, 1]} : vector<64x128xf32> to vector<8x128xf32>
    %48 = arith.truncf %45 : vector<8x32xf32> to vector<8x32xbf16>
    %c0_14 = arith.constant 0 : index
    %c0_15 = arith.constant 0 : index
    %49 = vector.load %arg2[%c0_14, %c0_15] : memref<32x128xbf16, #tpu.memory_space<vmem>>, vector<32x128xbf16>
    %cst_16 = arith.constant dense<0.000000e+00> : vector<8x128xf32>
    %50 = tpu.matmul %48, %49, %cst_16 {dimension_numbers = #tpu.dot_dimension_numbers<[1], [0], [0], [1], [0, 0, 1, 1], [], []>} : vector<8x32xbf16>, vector<32x128xbf16>, vector<8x128xf32> -> vector<8x128xf32>
    %51 = arith.addf %47, %50 : vector<8x128xf32>
    %52 = vector.extract_strided_slice %51 {offsets = [0, 0], sizes = [8, 96], strides = [1, 1]} : vector<8x128xf32> to vector<8x96xf32>
    %53 = arith.negf %52 : vector<8x96xf32>
    %54 = math.exp %53 : vector<8x96xf32>
    %cst_17 = arith.constant 1.000000e+00 : f32
    %55 = vector.broadcast %cst_17 : f32 to vector<8x96xf32>
    %56 = arith.addf %55, %54 : vector<8x96xf32>
    %57 = arith.divf %55, %56 : vector<8x96xf32>
    %58 = vector.extract_strided_slice %57 {offsets = [0, 0], sizes = [8, 32], strides = [1, 1]} : vector<8x96xf32> to vector<8x32xf32>
    %59 = vector.extract_strided_slice %57 {offsets = [0, 32], sizes = [8, 32], strides = [1, 1]} : vector<8x96xf32> to vector<8x32xf32>
    %60 = vector.extract_strided_slice %57 {offsets = [0, 64], sizes = [8, 32], strides = [1, 1]} : vector<8x96xf32> to vector<8x32xf32>
    %61 = vector.extract_strided_slice %51 {offsets = [0, 96], sizes = [8, 32], strides = [1, 1]} : vector<8x128xf32> to vector<8x32xf32>
    %62 = math.tanh %61 : vector<8x32xf32>
    %63 = arith.mulf %59, %43 : vector<8x32xf32>
    %64 = arith.mulf %58, %62 : vector<8x32xf32>
    %65 = arith.addf %63, %64 : vector<8x32xf32>
    %66 = math.tanh %65 : vector<8x32xf32>
    %67 = arith.mulf %60, %66 : vector<8x32xf32>
    %c16 = arith.constant 16 : index
    %c0_18 = arith.constant 0 : index
    %68 = vector.load %arg12[%c16, %c0_18] : memref<64x32xf32, #tpu.memory_space<vmem>>, vector<8x32xf32>
    tpu.vector_store %arg12[%c16, %c0_18], %67 {strides = array<i32>} : memref<64x32xf32, #tpu.memory_space<vmem>>, vector<8x32xf32>,
    %69 = vector.extract_strided_slice %5 {offsets = [24, 0], sizes = [8, 128], strides = [1, 1]} : vector<64x128xf32> to vector<8x128xf32>
    %70 = arith.truncf %67 : vector<8x32xf32> to vector<8x32xbf16>
    %c0_19 = arith.constant 0 : index
    %c0_20 = arith.constant 0 : index
    %71 = vector.load %arg2[%c0_19, %c0_20] : memref<32x128xbf16, #tpu.memory_space<vmem>>, vector<32x128xbf16>
    %cst_21 = arith.constant dense<0.000000e+00> : vector<8x128xf32>
    %72 = tpu.matmul %70, %71, %cst_21 {dimension_numbers = #tpu.dot_dimension_numbers<[1], [0], [0], [1], [0, 0, 1, 1], [], []>} : vector<8x32xbf16>, vector<32x128xbf16>, vector<8x128xf32> -> vector<8x128xf32>
    %73 = arith.addf %69, %72 : vector<8x128xf32>
    %74 = vector.extract_strided_slice %73 {offsets = [0, 0], sizes = [8, 96], strides = [1, 1]} : vector<8x128xf32> to vector<8x96xf32>
    %75 = arith.negf %74 : vector<8x96xf32>
    %76 = math.exp %75 : vector<8x96xf32>
    %cst_22 = arith.constant 1.000000e+00 : f32
    %77 = vector.broadcast %cst_22 : f32 to vector<8x96xf32>
    %78 = arith.addf %77, %76 : vector<8x96xf32>
    %79 = arith.divf %77, %78 : vector<8x96xf32>
    %80 = vector.extract_strided_slice %79 {offsets = [0, 0], sizes = [8, 32], strides = [1, 1]} : vector<8x96xf32> to vector<8x32xf32>
    %81 = vector.extract_strided_slice %79 {offsets = [0, 32], sizes = [8, 32], strides = [1, 1]} : vector<8x96xf32> to vector<8x32xf32>
    %82 = vector.extract_strided_slice %79 {offsets = [0, 64], sizes = [8, 32], strides = [1, 1]} : vector<8x96xf32> to vector<8x32xf32>
    %83 = vector.extract_strided_slice %73 {offsets = [0, 96], sizes = [8, 32], strides = [1, 1]} : vector<8x128xf32> to vector<8x32xf32>
    %84 = math.tanh %83 : vector<8x32xf32>
    %85 = arith.mulf %81, %65 : vector<8x32xf32>
    %86 = arith.mulf %80, %84 : vector<8x32xf32>
    %87 = arith.addf %85, %86 : vector<8x32xf32>
    %88 = math.tanh %87 : vector<8x32xf32>
    %89 = arith.mulf %82, %88 : vector<8x32xf32>
    %c24 = arith.constant 24 : index
    %c0_23 = arith.constant 0 : index
    %90 = vector.load %arg12[%c24, %c0_23] : memref<64x32xf32, #tpu.memory_space<vmem>>, vector<8x32xf32>
    tpu.vector_store %arg12[%c24, %c0_23], %89 {strides = array<i32>} : memref<64x32xf32, #tpu.memory_space<vmem>>, vector<8x32xf32>,
    %91 = vector.extract_strided_slice %5 {offsets = [32, 0], sizes = [8, 128], strides = [1, 1]} : vector<64x128xf32> to vector<8x128xf32>
    %92 = arith.truncf %89 : vector<8x32xf32> to vector<8x32xbf16>
    %c0_24 = arith.constant 0 : index
    %c0_25 = arith.constant 0 : index
    %93 = vector.load %arg2[%c0_24, %c0_25] : memref<32x128xbf16, #tpu.memory_space<vmem>>, vector<32x128xbf16>
    %cst_26 = arith.constant dense<0.000000e+00> : vector<8x128xf32>
    %94 = tpu.matmul %92, %93, %cst_26 {dimension_numbers = #tpu.dot_dimension_numbers<[1], [0], [0], [1], [0, 0, 1, 1], [], []>} : vector<8x32xbf16>, vector<32x128xbf16>, vector<8x128xf32> -> vector<8x128xf32>
    %95 = arith.addf %91, %94 : vector<8x128xf32>
    %96 = vector.extract_strided_slice %95 {offsets = [0, 0], sizes = [8, 96], strides = [1, 1]} : vector<8x128xf32> to vector<8x96xf32>
    %97 = arith.negf %96 : vector<8x96xf32>
    %98 = math.exp %97 : vector<8x96xf32>
    %cst_27 = arith.constant 1.000000e+00 : f32
    %99 = vector.broadcast %cst_27 : f32 to vector<8x96xf32>
    %100 = arith.addf %99, %98 : vector<8x96xf32>
    %101 = arith.divf %99, %100 : vector<8x96xf32>
    %102 = vector.extract_strided_slice %101 {offsets = [0, 0], sizes = [8, 32], strides = [1, 1]} : vector<8x96xf32> to vector<8x32xf32>
    %103 = vector.extract_strided_slice %101 {offsets = [0, 32], sizes = [8, 32], strides = [1, 1]} : vector<8x96xf32> to vector<8x32xf32>
    %104 = vector.extract_strided_slice %101 {offsets = [0, 64], sizes = [8, 32], strides = [1, 1]} : vector<8x96xf32> to vector<8x32xf32>
    %105 = vector.extract_strided_slice %95 {offsets = [0, 96], sizes = [8, 32], strides = [1, 1]} : vector<8x128xf32> to vector<8x32xf32>
    %106 = math.tanh %105 : vector<8x32xf32>
    %107 = arith.mulf %103, %87 : vector<8x32xf32>
    %108 = arith.mulf %102, %106 : vector<8x32xf32>
    %109 = arith.addf %107, %108 : vector<8x32xf32>
    %110 = math.tanh %109 : vector<8x32xf32>
    %111 = arith.mulf %104, %110 : vector<8x32xf32>
    %c32 = arith.constant 32 : index
    %c0_28 = arith.constant 0 : index
    %112 = vector.load %arg12[%c32, %c0_28] : memref<64x32xf32, #tpu.memory_space<vmem>>, vector<8x32xf32>
    tpu.vector_store %arg12[%c32, %c0_28], %111 {strides = array<i32>} : memref<64x32xf32, #tpu.memory_space<vmem>>, vector<8x32xf32>,
    %113 = vector.extract_strided_slice %5 {offsets = [40, 0], sizes = [8, 128], strides = [1, 1]} : vector<64x128xf32> to vector<8x128xf32>
    %114 = arith.truncf %111 : vector<8x32xf32> to vector<8x32xbf16>
    %c0_29 = arith.constant 0 : index
    %c0_30 = arith.constant 0 : index
    %115 = vector.load %arg2[%c0_29, %c0_30] : memref<32x128xbf16, #tpu.memory_space<vmem>>, vector<32x128xbf16>
    %cst_31 = arith.constant dense<0.000000e+00> : vector<8x128xf32>
    %116 = tpu.matmul %114, %115, %cst_31 {dimension_numbers = #tpu.dot_dimension_numbers<[1], [0], [0], [1], [0, 0, 1, 1], [], []>} : vector<8x32xbf16>, vector<32x128xbf16>, vector<8x128xf32> -> vector<8x128xf32>
    %117 = arith.addf %113, %116 : vector<8x128xf32>
    %118 = vector.extract_strided_slice %117 {offsets = [0, 0], sizes = [8, 96], strides = [1, 1]} : vector<8x128xf32> to vector<8x96xf32>
    %119 = arith.negf %118 : vector<8x96xf32>
    %120 = math.exp %119 : vector<8x96xf32>
    %cst_32 = arith.constant 1.000000e+00 : f32
    %121 = vector.broadcast %cst_32 : f32 to vector<8x96xf32>
    %122 = arith.addf %121, %120 : vector<8x96xf32>
    %123 = arith.divf %121, %122 : vector<8x96xf32>
    %124 = vector.extract_strided_slice %123 {offsets = [0, 0], sizes = [8, 32], strides = [1, 1]} : vector<8x96xf32> to vector<8x32xf32>
    %125 = vector.extract_strided_slice %123 {offsets = [0, 32], sizes = [8, 32], strides = [1, 1]} : vector<8x96xf32> to vector<8x32xf32>
    %126 = vector.extract_strided_slice %123 {offsets = [0, 64], sizes = [8, 32], strides = [1, 1]} : vector<8x96xf32> to vector<8x32xf32>
    %127 = vector.extract_strided_slice %117 {offsets = [0, 96], sizes = [8, 32], strides = [1, 1]} : vector<8x128xf32> to vector<8x32xf32>
    %128 = math.tanh %127 : vector<8x32xf32>
    %129 = arith.mulf %125, %109 : vector<8x32xf32>
    %130 = arith.mulf %124, %128 : vector<8x32xf32>
    %131 = arith.addf %129, %130 : vector<8x32xf32>
    %132 = math.tanh %131 : vector<8x32xf32>
    %133 = arith.mulf %126, %132 : vector<8x32xf32>
    %c40 = arith.constant 40 : index
    %c0_33 = arith.constant 0 : index
    %134 = vector.load %arg12[%c40, %c0_33] : memref<64x32xf32, #tpu.memory_space<vmem>>, vector<8x32xf32>
    tpu.vector_store %arg12[%c40, %c0_33], %133 {strides = array<i32>} : memref<64x32xf32, #tpu.memory_space<vmem>>, vector<8x32xf32>,
    %135 = vector.extract_strided_slice %5 {offsets = [48, 0], sizes = [8, 128], strides = [1, 1]} : vector<64x128xf32> to vector<8x128xf32>
    %136 = arith.truncf %133 : vector<8x32xf32> to vector<8x32xbf16>
    %c0_34 = arith.constant 0 : index
    %c0_35 = arith.constant 0 : index
    %137 = vector.load %arg2[%c0_34, %c0_35] : memref<32x128xbf16, #tpu.memory_space<vmem>>, vector<32x128xbf16>
    %cst_36 = arith.constant dense<0.000000e+00> : vector<8x128xf32>
    %138 = tpu.matmul %136, %137, %cst_36 {dimension_numbers = #tpu.dot_dimension_numbers<[1], [0], [0], [1], [0, 0, 1, 1], [], []>} : vector<8x32xbf16>, vector<32x128xbf16>, vector<8x128xf32> -> vector<8x128xf32>
    %139 = arith.addf %135, %138 : vector<8x128xf32>
    %140 = vector.extract_strided_slice %139 {offsets = [0, 0], sizes = [8, 96], strides = [1, 1]} : vector<8x128xf32> to vector<8x96xf32>
    %141 = arith.negf %140 : vector<8x96xf32>
    %142 = math.exp %141 : vector<8x96xf32>
    %cst_37 = arith.constant 1.000000e+00 : f32
    %143 = vector.broadcast %cst_37 : f32 to vector<8x96xf32>
    %144 = arith.addf %143, %142 : vector<8x96xf32>
    %145 = arith.divf %143, %144 : vector<8x96xf32>
    %146 = vector.extract_strided_slice %145 {offsets = [0, 0], sizes = [8, 32], strides = [1, 1]} : vector<8x96xf32> to vector<8x32xf32>
    %147 = vector.extract_strided_slice %145 {offsets = [0, 32], sizes = [8, 32], strides = [1, 1]} : vector<8x96xf32> to vector<8x32xf32>
    %148 = vector.extract_strided_slice %145 {offsets = [0, 64], sizes = [8, 32], strides = [1, 1]} : vector<8x96xf32> to vector<8x32xf32>
    %149 = vector.extract_strided_slice %139 {offsets = [0, 96], sizes = [8, 32], strides = [1, 1]} : vector<8x128xf32> to vector<8x32xf32>
    %150 = math.tanh %149 : vector<8x32xf32>
    %151 = arith.mulf %147, %131 : vector<8x32xf32>
    %152 = arith.mulf %146, %150 : vector<8x32xf32>
    %153 = arith.addf %151, %152 : vector<8x32xf32>
    %154 = math.tanh %153 : vector<8x32xf32>
    %155 = arith.mulf %148, %154 : vector<8x32xf32>
    %c48 = arith.constant 48 : index
    %c0_38 = arith.constant 0 : index
    %156 = vector.load %arg12[%c48, %c0_38] : memref<64x32xf32, #tpu.memory_space<vmem>>, vector<8x32xf32>
    tpu.vector_store %arg12[%c48, %c0_38], %155 {strides = array<i32>} : memref<64x32xf32, #tpu.memory_space<vmem>>, vector<8x32xf32>,
    %157 = vector.extract_strided_slice %5 {offsets = [56, 0], sizes = [8, 128], strides = [1, 1]} : vector<64x128xf32> to vector<8x128xf32>
    %158 = arith.truncf %155 : vector<8x32xf32> to vector<8x32xbf16>
    %c0_39 = arith.constant 0 : index
    %c0_40 = arith.constant 0 : index
    %159 = vector.load %arg2[%c0_39, %c0_40] : memref<32x128xbf16, #tpu.memory_space<vmem>>, vector<32x128xbf16>
    %cst_41 = arith.constant dense<0.000000e+00> : vector<8x128xf32>
    %160 = tpu.matmul %158, %159, %cst_41 {dimension_numbers = #tpu.dot_dimension_numbers<[1], [0], [0], [1], [0, 0, 1, 1], [], []>} : vector<8x32xbf16>, vector<32x128xbf16>, vector<8x128xf32> -> vector<8x128xf32>
    %161 = arith.addf %157, %160 : vector<8x128xf32>
    %162 = vector.extract_strided_slice %161 {offsets = [0, 0], sizes = [8, 96], strides = [1, 1]} : vector<8x128xf32> to vector<8x96xf32>
    %163 = arith.negf %162 : vector<8x96xf32>
    %164 = math.exp %163 : vector<8x96xf32>
    %cst_42 = arith.constant 1.000000e+00 : f32
    %165 = vector.broadcast %cst_42 : f32 to vector<8x96xf32>
    %166 = arith.addf %165, %164 : vector<8x96xf32>
    %167 = arith.divf %165, %166 : vector<8x96xf32>
    %168 = vector.extract_strided_slice %167 {offsets = [0, 0], sizes = [8, 32], strides = [1, 1]} : vector<8x96xf32> to vector<8x32xf32>
    %169 = vector.extract_strided_slice %167 {offsets = [0, 32], sizes = [8, 32], strides = [1, 1]} : vector<8x96xf32> to vector<8x32xf32>
    %170 = vector.extract_strided_slice %167 {offsets = [0, 64], sizes = [8, 32], strides = [1, 1]} : vector<8x96xf32> to vector<8x32xf32>
    %171 = vector.extract_strided_slice %161 {offsets = [0, 96], sizes = [8, 32], strides = [1, 1]} : vector<8x128xf32> to vector<8x32xf32>
    %172 = math.tanh %171 : vector<8x32xf32>
    %173 = arith.mulf %169, %153 : vector<8x32xf32>
    %174 = arith.mulf %168, %172 : vector<8x32xf32>
    %175 = arith.addf %173, %174 : vector<8x32xf32>
    %176 = math.tanh %175 : vector<8x32xf32>
    %177 = arith.mulf %170, %176 : vector<8x32xf32>
    %c56 = arith.constant 56 : index
    %c0_43 = arith.constant 0 : index
    %178 = vector.load %arg12[%c56, %c0_43] : memref<64x32xf32, #tpu.memory_space<vmem>>, vector<8x32xf32>
    tpu.vector_store %arg12[%c56, %c0_43], %177 {strides = array<i32>} : memref<64x32xf32, #tpu.memory_space<vmem>>, vector<8x32xf32>,
    %c0_44 = arith.constant 0 : index
    %c0_45 = arith.constant 0 : index
    %179 = vector.load %arg12[%c0_44, %c0_45] : memref<64x32xf32, #tpu.memory_space<vmem>>, vector<64x32xf32>
    %180 = arith.truncf %179 : vector<64x32xf32> to vector<64x32xbf16>
    %c0_46 = arith.constant 0 : index
    %c0_47 = arith.constant 0 : index
    %181 = vector.load %arg4[%c0_46, %c0_47] : memref<32x128xbf16, #tpu.memory_space<vmem>>, vector<32x128xbf16>
    %cst_48 = arith.constant dense<0.000000e+00> : vector<64x128xf32>
    %182 = tpu.matmul %180, %181, %cst_48 {dimension_numbers = #tpu.dot_dimension_numbers<[1], [0], [0], [1], [0, 0, 1, 1], [], []>} : vector<64x32xbf16>, vector<32x128xbf16>, vector<64x128xf32> -> vector<64x128xf32>
    %c0_49 = arith.constant 0 : index
    %c0_50 = arith.constant 0 : index
    %183 = vector.load %arg6[%c0_49, %c0_50] : memref<1x128xf32, #tpu.memory_space<vmem>>, vector<1x128xf32>
    %184 = vector.broadcast %183 : vector<1x128xf32> to vector<64x128xf32>
    %185 = arith.addf %182, %184 : vector<64x128xf32>
    %cst_51 = arith.constant 0.000000e+00 : f32
    %186 = vector.broadcast %cst_51 : f32 to vector<8x32xf32>
    %187 = vector.extract_strided_slice %185 {offsets = [0, 0], sizes = [8, 128], strides = [1, 1]} : vector<64x128xf32> to vector<8x128xf32>
    %188 = vector.extract_strided_slice %187 {offsets = [0, 0], sizes = [8, 96], strides = [1, 1]} : vector<8x128xf32> to vector<8x96xf32>
    %189 = arith.negf %188 : vector<8x96xf32>
    %190 = math.exp %189 : vector<8x96xf32>
    %cst_52 = arith.constant 1.000000e+00 : f32
    %191 = vector.broadcast %cst_52 : f32 to vector<8x96xf32>
    %192 = arith.addf %191, %190 : vector<8x96xf32>
    %193 = arith.divf %191, %192 : vector<8x96xf32>
    %194 = vector.extract_strided_slice %193 {offsets = [0, 0], sizes = [8, 32], strides = [1, 1]} : vector<8x96xf32> to vector<8x32xf32>
    %195 = vector.extract_strided_slice %193 {offsets = [0, 32], sizes = [8, 32], strides = [1, 1]} : vector<8x96xf32> to vector<8x32xf32>
    %196 = vector.extract_strided_slice %193 {offsets = [0, 64], sizes = [8, 32], strides = [1, 1]} : vector<8x96xf32> to vector<8x32xf32>
    %197 = vector.extract_strided_slice %187 {offsets = [0, 96], sizes = [8, 32], strides = [1, 1]} : vector<8x128xf32> to vector<8x32xf32>
    %198 = math.tanh %197 : vector<8x32xf32>
    %199 = arith.mulf %195, %186 : vector<8x32xf32>
    %200 = arith.mulf %194, %198 : vector<8x32xf32>
    %201 = arith.addf %199, %200 : vector<8x32xf32>
    %202 = math.tanh %201 : vector<8x32xf32>
    %203 = arith.mulf %196, %202 : vector<8x32xf32>
    %204 = vector.extract_strided_slice %185 {offsets = [8, 0], sizes = [8, 128], strides = [1, 1]} : vector<64x128xf32> to vector<8x128xf32>
    %205 = arith.truncf %203 : vector<8x32xf32> to vector<8x32xbf16>
    %c0_53 = arith.constant 0 : index
    %c0_54 = arith.constant 0 : index
    %206 = vector.load %arg5[%c0_53, %c0_54] : memref<32x128xbf16, #tpu.memory_space<vmem>>, vector<32x128xbf16>
    %cst_55 = arith.constant dense<0.000000e+00> : vector<8x128xf32>
    %207 = tpu.matmul %205, %206, %cst_55 {dimension_numbers = #tpu.dot_dimension_numbers<[1], [0], [0], [1], [0, 0, 1, 1], [], []>} : vector<8x32xbf16>, vector<32x128xbf16>, vector<8x128xf32> -> vector<8x128xf32>
    %208 = arith.addf %204, %207 : vector<8x128xf32>
    %209 = vector.extract_strided_slice %208 {offsets = [0, 0], sizes = [8, 96], strides = [1, 1]} : vector<8x128xf32> to vector<8x96xf32>
    %210 = arith.negf %209 : vector<8x96xf32>
    %211 = math.exp %210 : vector<8x96xf32>
    %cst_56 = arith.constant 1.000000e+00 : f32
    %212 = vector.broadcast %cst_56 : f32 to vector<8x96xf32>
    %213 = arith.addf %212, %211 : vector<8x96xf32>
    %214 = arith.divf %212, %213 : vector<8x96xf32>
    %215 = vector.extract_strided_slice %214 {offsets = [0, 0], sizes = [8, 32], strides = [1, 1]} : vector<8x96xf32> to vector<8x32xf32>
    %216 = vector.extract_strided_slice %214 {offsets = [0, 32], sizes = [8, 32], strides = [1, 1]} : vector<8x96xf32> to vector<8x32xf32>
    %217 = vector.extract_strided_slice %214 {offsets = [0, 64], sizes = [8, 32], strides = [1, 1]} : vector<8x96xf32> to vector<8x32xf32>
    %218 = vector.extract_strided_slice %208 {offsets = [0, 96], sizes = [8, 32], strides = [1, 1]} : vector<8x128xf32> to vector<8x32xf32>
    %219 = math.tanh %218 : vector<8x32xf32>
    %220 = arith.mulf %216, %201 : vector<8x32xf32>
    %221 = arith.mulf %215, %219 : vector<8x32xf32>
    %222 = arith.addf %220, %221 : vector<8x32xf32>
    %223 = math.tanh %222 : vector<8x32xf32>
    %224 = arith.mulf %217, %223 : vector<8x32xf32>
    %225 = vector.extract_strided_slice %185 {offsets = [16, 0], sizes = [8, 128], strides = [1, 1]} : vector<64x128xf32> to vector<8x128xf32>
    %226 = arith.truncf %224 : vector<8x32xf32> to vector<8x32xbf16>
    %c0_57 = arith.constant 0 : index
    %c0_58 = arith.constant 0 : index
    %227 = vector.load %arg5[%c0_57, %c0_58] : memref<32x128xbf16, #tpu.memory_space<vmem>>, vector<32x128xbf16>
    %cst_59 = arith.constant dense<0.000000e+00> : vector<8x128xf32>
    %228 = tpu.matmul %226, %227, %cst_59 {dimension_numbers = #tpu.dot_dimension_numbers<[1], [0], [0], [1], [0, 0, 1, 1], [], []>} : vector<8x32xbf16>, vector<32x128xbf16>, vector<8x128xf32> -> vector<8x128xf32>
    %229 = arith.addf %225, %228 : vector<8x128xf32>
    %230 = vector.extract_strided_slice %229 {offsets = [0, 0], sizes = [8, 96], strides = [1, 1]} : vector<8x128xf32> to vector<8x96xf32>
    %231 = arith.negf %230 : vector<8x96xf32>
    %232 = math.exp %231 : vector<8x96xf32>
    %cst_60 = arith.constant 1.000000e+00 : f32
    %233 = vector.broadcast %cst_60 : f32 to vector<8x96xf32>
    %234 = arith.addf %233, %232 : vector<8x96xf32>
    %235 = arith.divf %233, %234 : vector<8x96xf32>
    %236 = vector.extract_strided_slice %235 {offsets = [0, 0], sizes = [8, 32], strides = [1, 1]} : vector<8x96xf32> to vector<8x32xf32>
    %237 = vector.extract_strided_slice %235 {offsets = [0, 32], sizes = [8, 32], strides = [1, 1]} : vector<8x96xf32> to vector<8x32xf32>
    %238 = vector.extract_strided_slice %235 {offsets = [0, 64], sizes = [8, 32], strides = [1, 1]} : vector<8x96xf32> to vector<8x32xf32>
    %239 = vector.extract_strided_slice %229 {offsets = [0, 96], sizes = [8, 32], strides = [1, 1]} : vector<8x128xf32> to vector<8x32xf32>
    %240 = math.tanh %239 : vector<8x32xf32>
    %241 = arith.mulf %237, %222 : vector<8x32xf32>
    %242 = arith.mulf %236, %240 : vector<8x32xf32>
    %243 = arith.addf %241, %242 : vector<8x32xf32>
    %244 = math.tanh %243 : vector<8x32xf32>
    %245 = arith.mulf %238, %244 : vector<8x32xf32>
    %246 = vector.extract_strided_slice %185 {offsets = [24, 0], sizes = [8, 128], strides = [1, 1]} : vector<64x128xf32> to vector<8x128xf32>
    %247 = arith.truncf %245 : vector<8x32xf32> to vector<8x32xbf16>
    %c0_61 = arith.constant 0 : index
    %c0_62 = arith.constant 0 : index
    %248 = vector.load %arg5[%c0_61, %c0_62] : memref<32x128xbf16, #tpu.memory_space<vmem>>, vector<32x128xbf16>
    %cst_63 = arith.constant dense<0.000000e+00> : vector<8x128xf32>
    %249 = tpu.matmul %247, %248, %cst_63 {dimension_numbers = #tpu.dot_dimension_numbers<[1], [0], [0], [1], [0, 0, 1, 1], [], []>} : vector<8x32xbf16>, vector<32x128xbf16>, vector<8x128xf32> -> vector<8x128xf32>
    %250 = arith.addf %246, %249 : vector<8x128xf32>
    %251 = vector.extract_strided_slice %250 {offsets = [0, 0], sizes = [8, 96], strides = [1, 1]} : vector<8x128xf32> to vector<8x96xf32>
    %252 = arith.negf %251 : vector<8x96xf32>
    %253 = math.exp %252 : vector<8x96xf32>
    %cst_64 = arith.constant 1.000000e+00 : f32
    %254 = vector.broadcast %cst_64 : f32 to vector<8x96xf32>
    %255 = arith.addf %254, %253 : vector<8x96xf32>
    %256 = arith.divf %254, %255 : vector<8x96xf32>
    %257 = vector.extract_strided_slice %256 {offsets = [0, 0], sizes = [8, 32], strides = [1, 1]} : vector<8x96xf32> to vector<8x32xf32>
    %258 = vector.extract_strided_slice %256 {offsets = [0, 32], sizes = [8, 32], strides = [1, 1]} : vector<8x96xf32> to vector<8x32xf32>
    %259 = vector.extract_strided_slice %256 {offsets = [0, 64], sizes = [8, 32], strides = [1, 1]} : vector<8x96xf32> to vector<8x32xf32>
    %260 = vector.extract_strided_slice %250 {offsets = [0, 96], sizes = [8, 32], strides = [1, 1]} : vector<8x128xf32> to vector<8x32xf32>
    %261 = math.tanh %260 : vector<8x32xf32>
    %262 = arith.mulf %258, %243 : vector<8x32xf32>
    %263 = arith.mulf %257, %261 : vector<8x32xf32>
    %264 = arith.addf %262, %263 : vector<8x32xf32>
    %265 = math.tanh %264 : vector<8x32xf32>
    %266 = arith.mulf %259, %265 : vector<8x32xf32>
    %267 = vector.extract_strided_slice %185 {offsets = [32, 0], sizes = [8, 128], strides = [1, 1]} : vector<64x128xf32> to vector<8x128xf32>
    %268 = arith.truncf %266 : vector<8x32xf32> to vector<8x32xbf16>
    %c0_65 = arith.constant 0 : index
    %c0_66 = arith.constant 0 : index
    %269 = vector.load %arg5[%c0_65, %c0_66] : memref<32x128xbf16, #tpu.memory_space<vmem>>, vector<32x128xbf16>
    %cst_67 = arith.constant dense<0.000000e+00> : vector<8x128xf32>
    %270 = tpu.matmul %268, %269, %cst_67 {dimension_numbers = #tpu.dot_dimension_numbers<[1], [0], [0], [1], [0, 0, 1, 1], [], []>} : vector<8x32xbf16>, vector<32x128xbf16>, vector<8x128xf32> -> vector<8x128xf32>
    %271 = arith.addf %267, %270 : vector<8x128xf32>
    %272 = vector.extract_strided_slice %271 {offsets = [0, 0], sizes = [8, 96], strides = [1, 1]} : vector<8x128xf32> to vector<8x96xf32>
    %273 = arith.negf %272 : vector<8x96xf32>
    %274 = math.exp %273 : vector<8x96xf32>
    %cst_68 = arith.constant 1.000000e+00 : f32
    %275 = vector.broadcast %cst_68 : f32 to vector<8x96xf32>
    %276 = arith.addf %275, %274 : vector<8x96xf32>
    %277 = arith.divf %275, %276 : vector<8x96xf32>
    %278 = vector.extract_strided_slice %277 {offsets = [0, 0], sizes = [8, 32], strides = [1, 1]} : vector<8x96xf32> to vector<8x32xf32>
    %279 = vector.extract_strided_slice %277 {offsets = [0, 32], sizes = [8, 32], strides = [1, 1]} : vector<8x96xf32> to vector<8x32xf32>
    %280 = vector.extract_strided_slice %277 {offsets = [0, 64], sizes = [8, 32], strides = [1, 1]} : vector<8x96xf32> to vector<8x32xf32>
    %281 = vector.extract_strided_slice %271 {offsets = [0, 96], sizes = [8, 32], strides = [1, 1]} : vector<8x128xf32> to vector<8x32xf32>
    %282 = math.tanh %281 : vector<8x32xf32>
    %283 = arith.mulf %279, %264 : vector<8x32xf32>
    %284 = arith.mulf %278, %282 : vector<8x32xf32>
    %285 = arith.addf %283, %284 : vector<8x32xf32>
    %286 = math.tanh %285 : vector<8x32xf32>
    %287 = arith.mulf %280, %286 : vector<8x32xf32>
    %288 = vector.extract_strided_slice %185 {offsets = [40, 0], sizes = [8, 128], strides = [1, 1]} : vector<64x128xf32> to vector<8x128xf32>
    %289 = arith.truncf %287 : vector<8x32xf32> to vector<8x32xbf16>
    %c0_69 = arith.constant 0 : index
    %c0_70 = arith.constant 0 : index
    %290 = vector.load %arg5[%c0_69, %c0_70] : memref<32x128xbf16, #tpu.memory_space<vmem>>, vector<32x128xbf16>
    %cst_71 = arith.constant dense<0.000000e+00> : vector<8x128xf32>
    %291 = tpu.matmul %289, %290, %cst_71 {dimension_numbers = #tpu.dot_dimension_numbers<[1], [0], [0], [1], [0, 0, 1, 1], [], []>} : vector<8x32xbf16>, vector<32x128xbf16>, vector<8x128xf32> -> vector<8x128xf32>
    %292 = arith.addf %288, %291 : vector<8x128xf32>
    %293 = vector.extract_strided_slice %292 {offsets = [0, 0], sizes = [8, 96], strides = [1, 1]} : vector<8x128xf32> to vector<8x96xf32>
    %294 = arith.negf %293 : vector<8x96xf32>
    %295 = math.exp %294 : vector<8x96xf32>
    %cst_72 = arith.constant 1.000000e+00 : f32
    %296 = vector.broadcast %cst_72 : f32 to vector<8x96xf32>
    %297 = arith.addf %296, %295 : vector<8x96xf32>
    %298 = arith.divf %296, %297 : vector<8x96xf32>
    %299 = vector.extract_strided_slice %298 {offsets = [0, 0], sizes = [8, 32], strides = [1, 1]} : vector<8x96xf32> to vector<8x32xf32>
    %300 = vector.extract_strided_slice %298 {offsets = [0, 32], sizes = [8, 32], strides = [1, 1]} : vector<8x96xf32> to vector<8x32xf32>
    %301 = vector.extract_strided_slice %298 {offsets = [0, 64], sizes = [8, 32], strides = [1, 1]} : vector<8x96xf32> to vector<8x32xf32>
    %302 = vector.extract_strided_slice %292 {offsets = [0, 96], sizes = [8, 32], strides = [1, 1]} : vector<8x128xf32> to vector<8x32xf32>
    %303 = math.tanh %302 : vector<8x32xf32>
    %304 = arith.mulf %300, %285 : vector<8x32xf32>
    %305 = arith.mulf %299, %303 : vector<8x32xf32>
    %306 = arith.addf %304, %305 : vector<8x32xf32>
    %307 = math.tanh %306 : vector<8x32xf32>
    %308 = arith.mulf %301, %307 : vector<8x32xf32>
    %309 = vector.extract_strided_slice %185 {offsets = [48, 0], sizes = [8, 128], strides = [1, 1]} : vector<64x128xf32> to vector<8x128xf32>
    %310 = arith.truncf %308 : vector<8x32xf32> to vector<8x32xbf16>
    %c0_73 = arith.constant 0 : index
    %c0_74 = arith.constant 0 : index
    %311 = vector.load %arg5[%c0_73, %c0_74] : memref<32x128xbf16, #tpu.memory_space<vmem>>, vector<32x128xbf16>
    %cst_75 = arith.constant dense<0.000000e+00> : vector<8x128xf32>
    %312 = tpu.matmul %310, %311, %cst_75 {dimension_numbers = #tpu.dot_dimension_numbers<[1], [0], [0], [1], [0, 0, 1, 1], [], []>} : vector<8x32xbf16>, vector<32x128xbf16>, vector<8x128xf32> -> vector<8x128xf32>
    %313 = arith.addf %309, %312 : vector<8x128xf32>
    %314 = vector.extract_strided_slice %313 {offsets = [0, 0], sizes = [8, 96], strides = [1, 1]} : vector<8x128xf32> to vector<8x96xf32>
    %315 = arith.negf %314 : vector<8x96xf32>
    %316 = math.exp %315 : vector<8x96xf32>
    %cst_76 = arith.constant 1.000000e+00 : f32
    %317 = vector.broadcast %cst_76 : f32 to vector<8x96xf32>
    %318 = arith.addf %317, %316 : vector<8x96xf32>
    %319 = arith.divf %317, %318 : vector<8x96xf32>
    %320 = vector.extract_strided_slice %319 {offsets = [0, 0], sizes = [8, 32], strides = [1, 1]} : vector<8x96xf32> to vector<8x32xf32>
    %321 = vector.extract_strided_slice %319 {offsets = [0, 32], sizes = [8, 32], strides = [1, 1]} : vector<8x96xf32> to vector<8x32xf32>
    %322 = vector.extract_strided_slice %319 {offsets = [0, 64], sizes = [8, 32], strides = [1, 1]} : vector<8x96xf32> to vector<8x32xf32>
    %323 = vector.extract_strided_slice %313 {offsets = [0, 96], sizes = [8, 32], strides = [1, 1]} : vector<8x128xf32> to vector<8x32xf32>
    %324 = math.tanh %323 : vector<8x32xf32>
    %325 = arith.mulf %321, %306 : vector<8x32xf32>
    %326 = arith.mulf %320, %324 : vector<8x32xf32>
    %327 = arith.addf %325, %326 : vector<8x32xf32>
    %328 = math.tanh %327 : vector<8x32xf32>
    %329 = arith.mulf %322, %328 : vector<8x32xf32>
    %330 = vector.extract_strided_slice %185 {offsets = [56, 0], sizes = [8, 128], strides = [1, 1]} : vector<64x128xf32> to vector<8x128xf32>
    %331 = arith.truncf %329 : vector<8x32xf32> to vector<8x32xbf16>
    %c0_77 = arith.constant 0 : index
    %c0_78 = arith.constant 0 : index
    %332 = vector.load %arg5[%c0_77, %c0_78] : memref<32x128xbf16, #tpu.memory_space<vmem>>, vector<32x128xbf16>
    %cst_79 = arith.constant dense<0.000000e+00> : vector<8x128xf32>
    %333 = tpu.matmul %331, %332, %cst_79 {dimension_numbers = #tpu.dot_dimension_numbers<[1], [0], [0], [1], [0, 0, 1, 1], [], []>} : vector<8x32xbf16>, vector<32x128xbf16>, vector<8x128xf32> -> vector<8x128xf32>
    %334 = arith.addf %330, %333 : vector<8x128xf32>
    %335 = vector.extract_strided_slice %334 {offsets = [0, 0], sizes = [8, 96], strides = [1, 1]} : vector<8x128xf32> to vector<8x96xf32>
    %336 = arith.negf %335 : vector<8x96xf32>
    %337 = math.exp %336 : vector<8x96xf32>
    %cst_80 = arith.constant 1.000000e+00 : f32
    %338 = vector.broadcast %cst_80 : f32 to vector<8x96xf32>
    %339 = arith.addf %338, %337 : vector<8x96xf32>
    %340 = arith.divf %338, %339 : vector<8x96xf32>
    %341 = vector.extract_strided_slice %340 {offsets = [0, 0], sizes = [8, 32], strides = [1, 1]} : vector<8x96xf32> to vector<8x32xf32>
    %342 = vector.extract_strided_slice %340 {offsets = [0, 32], sizes = [8, 32], strides = [1, 1]} : vector<8x96xf32> to vector<8x32xf32>
    %343 = vector.extract_strided_slice %340 {offsets = [0, 64], sizes = [8, 32], strides = [1, 1]} : vector<8x96xf32> to vector<8x32xf32>
    %344 = vector.extract_strided_slice %334 {offsets = [0, 96], sizes = [8, 32], strides = [1, 1]} : vector<8x128xf32> to vector<8x32xf32>
    %345 = math.tanh %344 : vector<8x32xf32>
    %346 = arith.mulf %342, %327 : vector<8x32xf32>
    %347 = arith.mulf %341, %345 : vector<8x32xf32>
    %348 = arith.addf %346, %347 : vector<8x32xf32>
    %349 = math.tanh %348 : vector<8x32xf32>
    %350 = arith.mulf %343, %349 : vector<8x32xf32>
    %351 = arith.truncf %350 : vector<8x32xf32> to vector<8x32xbf16>
    %c0_81 = arith.constant 0 : index
    %c0_82 = arith.constant 0 : index
    %352 = vector.load %arg7[%c0_81, %c0_82] : memref<32x64xbf16, #tpu.memory_space<vmem>>, vector<32x64xbf16>
    %cst_83 = arith.constant dense<0.000000e+00> : vector<8x64xf32>
    %353 = tpu.matmul %351, %352, %cst_83 {dimension_numbers = #tpu.dot_dimension_numbers<[1], [0], [0], [1], [0, 0, 1, 1], [], []>} : vector<8x32xbf16>, vector<32x64xbf16>, vector<8x64xf32> -> vector<8x64xf32>
    %c0_84 = arith.constant 0 : index
    %c0_85 = arith.constant 0 : index
    %354 = vector.load %arg8[%c0_84, %c0_85] : memref<1x64xf32, #tpu.memory_space<vmem>>, vector<1x64xf32>
    %355 = vector.broadcast %354 : vector<1x64xf32> to vector<8x64xf32>
    %356 = arith.addf %353, %355 : vector<8x64xf32>
    %cst_86 = arith.constant 0.000000e+00 : f32
    %357 = vector.broadcast %cst_86 : f32 to vector<8x64xf32>
    %358 = arith.maximumf %356, %357 : vector<8x64xf32>
    %359 = arith.truncf %358 : vector<8x64xf32> to vector<8x64xbf16>
    %c0_87 = arith.constant 0 : index
    %c0_88 = arith.constant 0 : index
    %360 = vector.load %arg9[%c0_87, %c0_88] : memref<64x4xbf16, #tpu.memory_space<vmem>>, vector<64x4xbf16>
    %cst_89 = arith.constant dense<0.000000e+00> : vector<8x4xf32>
    %361 = tpu.matmul %359, %360, %cst_89 {dimension_numbers = #tpu.dot_dimension_numbers<[1], [0], [0], [1], [0, 0, 1, 1], [], []>} : vector<8x64xbf16>, vector<64x4xbf16>, vector<8x4xf32> -> vector<8x4xf32>
    %c0_90 = arith.constant 0 : index
    %c0_91 = arith.constant 0 : index
    %362 = vector.load %arg10[%c0_90, %c0_91] : memref<1x4xf32, #tpu.memory_space<vmem>>, vector<1x4xf32>
    %363 = vector.broadcast %362 : vector<1x4xf32> to vector<8x4xf32>
    %364 = arith.addf %361, %363 : vector<8x4xf32>
    %c0_92 = arith.constant 0 : index
    %c0_93 = arith.constant 0 : index
    %365 = vector.load %arg11[%c0_92, %c0_93] : memref<8x4xf32, #tpu.memory_space<vmem>>, vector<8x4xf32>
    tpu.vector_store %arg11[%c0_92, %c0_93], %364 {strides = array<i32>} : memref<8x4xf32, #tpu.memory_space<vmem>>, vector<8x4xf32>,
    return
  }
}

</mosaic_0001>

<bundles_post_ra>
// kernel: lstm_model_forward.1
= control target key start
LH: loop header
LB: loop body
LE: loop exit
PB: predicated region body
PF: predicated region fallthrough
CT: control target
= control target key end

     0   :  { %vm82_vm0 = vcmask 130048   ;;  %v2108_v19 = vmov 0.0   ;;  %vm2109_vm1 = vmmov 0   ;;  %vm188_vm2 = vcmask 261120   ;;  %s2559_s1 = inlined_call_operand.vmem [shape: bf16[16,128], index: 1, kind: input, shape index: {}]   ;;  %s2560_s0 = inlined_call_operand.vmem [shape: bf16[64,16], index: 0, kind: input, shape index: {}]   ;;  %s2561_s3 = inlined_call_operand.vmem [shape: f32[1,128], index: 3, kind: input, shape index: {}]   ;;  %s2562_s2 = inlined_call_operand.vmem [shape: bf16[32,128], index: 2, kind: input, shape index: {}]   ;;  %s2563_s4 = inlined_call_operand.vmem [shape: bf16[32,128], index: 4, kind: input, shape index: {}]   ;;  %s2564_s6 = inlined_call_operand.vmem [shape: f32[1,128], index: 6, kind: input, shape index: {}]   ;;  %s2565_s5 = inlined_call_operand.vmem [shape: bf16[32,128], index: 5, kind: input, shape index: {}]   ;;  %s2566_s7 = inlined_call_operand.vmem [shape: bf16[32,64], index: 7, kind: input, shape index: {}]   ;;  %s2567_s9 = inlined_call_operand.vmem [shape: bf16[64,4], index: 9, kind: input, shape index: {}]   ;;  %s2568_s8 = inlined_call_operand.vmem [shape: f32[1,64], index: 8, kind: input, shape index: {}]   ;;  %s2569_s10 = inlined_call_operand.vmem [shape: f32[1,4], index: 10, kind: input, shape index: {}]   ;;  %s2570_s11 = inlined_call_operand.vmem [shape: f32[8,4], index: 11, kind: output, shape index: {}]  }
   0x1   :  { %v1950_v0 = vld [vmem:[%s2559_s1] sm:$0xff]   ;;  %v1952_v2 = vld [vmem:[%s2560_s0 + $0x8] sm:$0xff]   ;;  %s2107_s1 = smov 32   ;;  %v1954_v17 = vld [vmem:[%s2560_s0 + $0x10] sm:$0xff]   ;;  %1810 = vmatprep.subr.bf16.mxu1 %v2108_v19  ;;  %1814 = vmatprep.mubr.msk.bf16.mxu1 %vm2109_vm1, %v2108_v19  ;;  %vm1608_vm3 = vcmask 523264   ;;  %vm1652_vm4 = vcmask 31744  }
   0x2   :  { %v1951_v1 = vld [vmem:[%s2560_s0] sm:$0xff]   ;;  %1792 = vmatprep.subr.bf16.mxu0 %v1950_v0  ;;  %v1955_v18 = vld [vmem:[%s2560_s0 + $0x18] sm:$0xff]   ;;  %v1953_v20 = vld [vmem:[%s2562_s2 + $0x8] sm:$0xff]   ;;  %s2110_s0 = smov 64  }
   0x3   :  { %1793 = vmatpush3.bf16.msra.mxu0 %v1950_v0  ;;  %1794 = vmatprep.mubr.msk.bf16.mxu0 %vm82_vm0, %v1951_v1  ;;  %v2187_v4 = vld [vmem:[%s2561_s3] ss:$0 sm:$0xff]  ;;  %v1957_v49 = vld [vmem:[%s2562_s2 + $0x8] sm:$0xff]  }
   0x4   :  { %1802 = vmatprep.subr.bf16.mxu0 %v2108_v19  ;;  %v1956_v21 = vld [vmem:[%s2562_s2] sm:$0xff]   ;;  %1811 = vmatpush3.bf16.msra.mxu1 %v1957_v49 }
   0x5   :  { %v1958_v50 = vld [vmem:[%s2562_s2] sm:$0xff]   ;;  %1812 = vmatprep.subr.bf16.mxu1 %v2108_v19 }
   0x6   :  { %1795 = vmatmul.mubr.msk.bf16.vlgmr.msra.gmra.mxu0 %vm82_vm0, %v1952_v2 }
   0x7   :  { %1798 = vmatprep.mubr.msk.bf16.mxu0 %vm82_vm0, %v1954_v17  ;;  %1803 = vmatpush3.bf16.msra.mxu0 %v1953_v20 }
   0x8   :  { %1804 = vmatprep.subr.bf16.mxu0 %v2108_v19  ;;  %1813 = vmatpush3.bf16.msra.mxu1 %v1958_v50 }
   0x9   :  { %1826 = vmatprep.subr.bf16.mxu1 %v2108_v19 }
   0xb   :  { %1805 = vmatpush3.bf16.msra.mxu0 %v1956_v21 }
   0xc   :  { %1818 = vmatprep.subr.bf16.mxu0 %v2108_v19 }
   0xe   :  { %1799 = vmatmul.mubr.msk.bf16.gmra.mxu0 %vm82_vm0, %v1955_v18 }
   0xf   :  { %1806 = vmatprep.mubr.msk.bf16.mxu0 %vm2109_vm1, %v2108_v19 }
  0xc6   :  { %v2182_v3 = vpop.f32.mrf.mxu0 }
  0xc7   :  { %v138_v56 = vadd.f32 %v2182_v3, %v2187_v4 }
  0xc8   :  { %v129_v5 = vpop.f32.mrf.mxu0 }
  0xc9   :  { %v130_v6 = vadd.f32 %v2187_v4, %v129_v5 }
  0xca   :  { %v2223_v27 = vpop.f32.mrf.mxu0 }
  0xcb   :  { %1979 = vtanh.f32 %v130_v6  ;;  %v1668_v8 = vmul.f32 -1.442695, %v130_v6 }
  0xcc   :  { %v132_v28 = vpop.f32.mrf.mxu0 }
  0xcd   :  { %1981 = vpow2.f32 %v1668_v8  ;;  %v133_v33 = vadd.f32 %v2187_v4, %v132_v28 }
  0xce   :  { %v2225_v29 = vpop.f32.mrf.mxu0 }
  0xd0   :  { %v2227_v30 = vpop.f32.mrf.mxu0 }
  0xd2   :  { %v2229_v31 = vpop.f32.mrf.mxu0 }
  0xd4   :  { %v2231_v32 = vpop.f32.mrf.mxu0 }
  0xd8   :  { %v1980_v7 = vpop.eup %1979 }
  0xd9   :  { %169 = vrot.lane.b32.xlu0 %v1980_v7, %s2107_s1 }
  0xda   :  { %v1982_v9 = vpop.eup %1981 }
  0xdb   :  { %v163_v10 = vadd.f32 1.0, %v1982_v9  ;;  %v1959_v9 = vld [vmem:[%s2562_s2 + $0x8] sm:$0xff]  }
  0xdd   :  { %1983 = vrcp.f32 %v163_v10  ;;  %v1960_v10 = vld [vmem:[%s2562_s2] sm:$0xff]  }
  0xea   :  { %v1984_v11 = vpop.eup %1983 }
  0xeb   :  { %v167_v14 = vmul.f32 0.0, %v1984_v11 }
 0x14b   :  { %v170_v12 = vpop.permute.xlu0 %169 }
 0x14c   :  { %v172_v13 = vmul.f32 %v1984_v11, %v170_v12 }
 0x14e   :  { %174 = vrot.lane.b32.xlu0 %v172_v13, %s2107_s1 }
 0x1c0   :  { %v175_v15 = vpop.permute.xlu0 %174 }
 0x1c1   :  { %v177_v16 = vadd.f32 %v175_v15, %v167_v14 }
 0x1c3   :  { %1985 = vtanh.f32 %v177_v16 }
 0x1d0   :  { %v1986_v22 = vpop.eup %1985 }
 0x1d1   :  { %180 = vrot.lane.b32.xlu1 %v1986_v22, %s2107_s1 }
 0x243   :  { %v181_v23 = vpop.permute.xlu1 %180 }
 0x244   :  { %v2215_v24 = vmul.f32 %v1984_v11, %v181_v23 }
 0x246   :  { %v190_v25 = vpack.c.bf16 %v2215_v24, %v2215_v24 }
 0x248   :  { %196 = vrot.lane.b32.xlu1 %v190_v25, %s2110_s0 }
 0x2ba   :  { %v197_v26 = vpop.permute.xlu1 %196 }
 0x2bb   :  { %1807 = vmatmul.mubr.msk.bf16.vlgmr.msra.gmra.mxu0 %vm188_vm2, %v197_v26 }
 0x2bc   :  { %1822 = vmatprep.mubr.msk.bf16.mxu0 %vm2109_vm1, %v2108_v19  ;;  %1819 = vmatpush3.bf16.msra.mxu0 %v1959_v9 }
 0x2bd   :  { %1820 = vmatprep.subr.bf16.mxu0 %v2108_v19 }
 0x2c0   :  { %1821 = vmatpush3.bf16.msra.mxu0 %v1960_v10 }
 0x2c1   :  { %1834 = vmatprep.subr.bf16.mxu0 %v2108_v19 }
 0x37b   :  { %v247_v34 = vpop.f32.mrf.mxu0 }
 0x37c   :  { %v253_v35 = vadd.f32 %v247_v34, %v133_v33 }
 0x37d   :  { %v1808_v36 = vpop.f32.mrf.mxu0 }
 0x37e   :  { %1987 = vtanh.f32 %v253_v35  ;;  %v1672_v40 = vmul.f32 -1.442695, %v253_v35 }
 0x37f   :  { %v250_v37 = vpop.f32.mrf.mxu0 }
 0x380   :  { %1989 = vpow2.f32 %v1672_v40 }
 0x381   :  { %v1809_v38 = vpop.f32.mrf.mxu0 }
 0x382   :  { %v1961_v38 = vld [vmem:[%s2562_s2 + $0x8] sm:$0xff]  }
 0x38b   :  { %v1988_v39 = vpop.eup %1987 }
 0x38c   :  { %263 = vrot.lane.b32.xlu0 %v1988_v39, %s2107_s1  ;;  %v1962_v39 = vld [vmem:[%s2562_s2] sm:$0xff]  }
 0x38d   :  { %v1990_v41 = vpop.eup %1989 }
 0x38e   :  { %v257_v42 = vadd.f32 1.0, %v1990_v41 }
 0x390   :  { %1991 = vrcp.f32 %v257_v42 }
 0x39d   :  { %v1992_v43 = vpop.eup %1991 }
 0x39e   :  { %v261_v46 = vmul.f32 %v1992_v43, %v177_v16  ;;  %v141_v16 = vadd.f32 %v2223_v27, %v2187_v4 }
 0x3fe   :  { %v264_v44 = vpop.permute.xlu0 %263 }
 0x3ff   :  { %v266_v45 = vmul.f32 %v1992_v43, %v264_v44 }
 0x401   :  { %268 = vrot.lane.b32.xlu1 %v266_v45, %s2107_s1  ;;  %v146_v45 = vadd.f32 %v2187_v4, %v2227_v30 }
 0x473   :  { %v269_v47 = vpop.permute.xlu1 %268 }
 0x474   :  { %v271_v48 = vadd.f32 %v269_v47, %v261_v46 }
 0x476   :  { %1993 = vtanh.f32 %v271_v48 }
 0x483   :  { %v1994_v51 = vpop.eup %1993 }
 0x484   :  { %274 = vrot.lane.b32.xlu0 %v1994_v51, %s2107_s1 }
 0x4f6   :  { %v275_v52 = vpop.permute.xlu0 %274 }
 0x4f7   :  { %v2245_v53 = vmul.f32 %v1992_v43, %v275_v52 }
 0x4f9   :  { %v283_v54 = vpack.c.bf16 %v2245_v53, %v2245_v53 }
 0x4fb   :  { %289 = vrot.lane.b32.xlu1 %v283_v54, %s2110_s0 }
 0x56d   :  { %v290_v55 = vpop.permute.xlu1 %289 }
 0x56e   :  { %1815 = vmatmul.mubr.msk.bf16.vlgmr.msra.gmra.mxu1 %vm188_vm2, %v290_v55 }
 0x56f   :  { %1830 = vmatprep.mubr.msk.bf16.mxu1 %vm2109_vm1, %v2108_v19  ;;  %1827 = vmatpush3.bf16.msra.mxu1 %v1961_v38 }
 0x570   :  { %1828 = vmatprep.subr.bf16.mxu1 %v2108_v19 }
 0x573   :  { %1829 = vmatpush3.bf16.msra.mxu1 %v1962_v39 }
 0x574   :  { %1842 = vmatprep.subr.bf16.mxu1 %v2108_v19 }
 0x62e   :  { %v340_v57 = vpop.f32.mrf.mxu1 }
 0x62f   :  { %v346_v58 = vadd.f32 %v340_v57, %v138_v56 }
 0x630   :  { %v1816_v59 = vpop.f32.mrf.mxu1 }
 0x631   :  { %1995 = vtanh.f32 %v346_v58  ;;  %v1676_v63 = vmul.f32 -1.442695, %v346_v58 }
 0x632   :  { %v343_v60 = vpop.f32.mrf.mxu1 }
 0x633   :  { %1997 = vpow2.f32 %v1676_v63 }
 0x634   :  { %v1817_v61 = vpop.f32.mrf.mxu1 }
 0x635   :  { %v1963_v61 = vld [vmem:[%s2562_s2 + $0x8] sm:$0xff]  }
 0x63e   :  { %v1996_v62 = vpop.eup %1995 }
 0x63f   :  { %356 = vrot.lane.b32.xlu0 %v1996_v62, %s2107_s1  ;;  %v1964_v62 = vld [vmem:[%s2562_s2] sm:$0xff]  }
 0x640   :  { %v1998_v0 = vpop.eup %1997 }
 0x641   :  { %v350_v1 = vadd.f32 1.0, %v1998_v0 }
 0x643   :  { %1999 = vrcp.f32 %v350_v1 }
 0x650   :  { %v2000_v2 = vpop.eup %1999 }
 0x651   :  { %v354_v3 = vmul.f32 %v2000_v2, %v271_v48 }
 0x6b1   :  { %v357_v5 = vpop.permute.xlu0 %356 }
 0x6b2   :  { %v359_v6 = vmul.f32 %v2000_v2, %v357_v5 }
 0x6b4   :  { %361 = vrot.lane.b32.xlu1 %v359_v6, %s2107_s1  ;;  %v149_v6 = vadd.f32 %v2187_v4, %v2231_v32 }
 0x726   :  { %v362_v7 = vpop.permute.xlu1 %361 }
 0x727   :  { %v364_v8 = vadd.f32 %v362_v7, %v354_v3 }
 0x729   :  { %2001 = vtanh.f32 %v364_v8 }
 0x736   :  { %v2002_v11 = vpop.eup %2001 }
 0x737   :  { %367 = vrot.lane.b32.xlu0 %v2002_v11, %s2107_s1 }
 0x7a9   :  { %v368_v12 = vpop.permute.xlu0 %367 }
 0x7aa   :  { %v2266_v13 = vmul.f32 %v2000_v2, %v368_v12 }
 0x7ac   :  { %v376_v14 = vpack.c.bf16 %v2266_v13, %v2266_v13 }
 0x7ae   :  { %382 = vrot.lane.b32.xlu1 %v376_v14, %s2110_s0 }
 0x820   :  { %v383_v15 = vpop.permute.xlu1 %382 }
 0x821   :  { %1823 = vmatmul.mubr.msk.bf16.vlgmr.msra.gmra.mxu0 %vm188_vm2, %v383_v15 }
 0x822   :  { %1838 = vmatprep.mubr.msk.bf16.mxu0 %vm2109_vm1, %v2108_v19  ;;  %1835 = vmatpush3.bf16.msra.mxu0 %v1963_v61 }
 0x823   :  { %1836 = vmatprep.subr.bf16.mxu0 %v2108_v19 }
 0x826   :  { %1837 = vmatpush3.bf16.msra.mxu0 %v1964_v62 }
 0x827   :  { %1850 = vmatprep.subr.bf16.mxu0 %v2108_v19 }
 0x8e1   :  { %v433_v17 = vpop.f32.mrf.mxu0 }
 0x8e2   :  { %v439_v18 = vadd.f32 %v433_v17, %v141_v16 }
 0x8e3   :  { %v1824_v20 = vpop.f32.mrf.mxu0 }
 0x8e4   :  { %2003 = vtanh.f32 %v439_v18  ;;  %v1680_v25 = vmul.f32 -1.442695, %v439_v18 }
 0x8e5   :  { %v436_v21 = vpop.f32.mrf.mxu0 }
 0x8e6   :  { %2005 = vpow2.f32 %v1680_v25  ;;  %v1965_v25 = vld [vmem:[%s2562_s2 + $0x8] sm:$0xff]  }
 0x8e7   :  { %v1825_v22 = vpop.f32.mrf.mxu0 }
 0x8f1   :  { %v2004_v23 = vpop.eup %2003 }
 0x8f2   :  { %449 = vrot.lane.b32.xlu0 %v2004_v23, %s2107_s1 }
 0x8f3   :  { %v2006_v26 = vpop.eup %2005 }
 0x8f4   :  { %v443_v28 = vadd.f32 1.0, %v2006_v26 }
 0x8f6   :  { %2007 = vrcp.f32 %v443_v28 }
 0x903   :  { %v2008_v33 = vpop.eup %2007 }
 0x904   :  { %v447_v27 = vmul.f32 %v2008_v33, %v364_v8 }
 0x964   :  { %v450_v34 = vpop.permute.xlu0 %449 }
 0x965   :  { %v452_v35 = vmul.f32 %v2008_v33, %v450_v34 }
 0x967   :  { %454 = vrot.lane.b32.xlu1 %v452_v35, %s2107_s1 }
 0x9d9   :  { %v455_v36 = vpop.permute.xlu1 %454 }
 0x9da   :  { %v457_v37 = vadd.f32 %v455_v36, %v447_v27 }
 0x9dc   :  { %2009 = vtanh.f32 %v457_v37 }
 0x9e9   :  { %v2010_v40 = vpop.eup %2009 }
 0x9ea   :  { %460 = vrot.lane.b32.xlu0 %v2010_v40, %s2107_s1 }
 0xa5c   :  { %v461_v41 = vpop.permute.xlu0 %460 }
 0xa5d   :  { %v2287_v42 = vmul.f32 %v2008_v33, %v461_v41 }
 0xa5f   :  { %v469_v43 = vpack.c.bf16 %v2287_v42, %v2287_v42 }
 0xa61   :  { %475 = vrot.lane.b32.xlu1 %v469_v43, %s2110_s0  ;;  %v154_v43 = vadd.f32 %v2225_v29, %v2187_v4 }
 0xad3   :  { %v476_v44 = vpop.permute.xlu1 %475 }
 0xad4   :  { %1831 = vmatmul.mubr.msk.bf16.vlgmr.msra.gmra.mxu1 %vm188_vm2, %v476_v44 }
 0xad5   :  { %1846 = vmatprep.mubr.msk.bf16.mxu1 %vm2109_vm1, %v2108_v19  ;;  %1843 = vmatpush3.bf16.msra.mxu1 %v1965_v25 }
 0xad6   :  { %1844 = vmatprep.subr.bf16.mxu1 %v2108_v19 }
 0xb94   :  { %v526_v46 = vpop.f32.mrf.mxu1 }
 0xb95   :  { %v532_v47 = vadd.f32 %v526_v46, %v146_v45 }
 0xb96   :  { %v1832_v48 = vpop.f32.mrf.mxu1 }
 0xb97   :  { %2011 = vtanh.f32 %v532_v47  ;;  %v1684_v52 = vmul.f32 -1.442695, %v532_v47 }
 0xb98   :  { %v529_v49 = vpop.f32.mrf.mxu1 }
 0xb99   :  { %2013 = vpow2.f32 %v1684_v52 }
 0xb9a   :  { %v1833_v50 = vpop.f32.mrf.mxu1 }
 0xb9b   :  { %v2365_v50 = vld [vmem:[%s2564_s6] ss:$0 sm:$0xff] }
 0xba4   :  { %v2012_v51 = vpop.eup %2011 }
 0xba5   :  { %542 = vrot.lane.b32.xlu0 %v2012_v51, %s2107_s1 }
 0xba6   :  { %v2014_v54 = vpop.eup %2013 }
 0xba7   :  { %v536_v55 = vadd.f32 1.0, %v2014_v54 }
 0xba9   :  { %2015 = vrcp.f32 %v536_v55 }
 0xbb6   :  { %v2016_v56 = vpop.eup %2015 }
 0xbb7   :  { %v540_v30 = vmul.f32 %v2016_v56, %v457_v37 }
 0xc17   :  { %v543_v57 = vpop.permute.xlu0 %542 }
 0xc18   :  { %v545_v58 = vmul.f32 %v2016_v56, %v543_v57 }
 0xc1a   :  { %547 = vrot.lane.b32.xlu1 %v545_v58, %s2107_s1 }
 0xc8c   :  { %v548_v59 = vpop.permute.xlu1 %547 }
 0xc8d   :  { %v550_v60 = vadd.f32 %v548_v59, %v540_v30 }
 0xc8f   :  { %2017 = vtanh.f32 %v550_v60 }
 0xc9c   :  { %v2018_v63 = vpop.eup %2017 }
 0xc9d   :  { %553 = vrot.lane.b32.xlu0 %v2018_v63, %s2107_s1 }
 0xd0f   :  { %v554_v0 = vpop.permute.xlu0 %553 }
 0xd10   :  { %v2308_v1 = vmul.f32 %v2016_v56, %v554_v0 }
 0xd12   :  { %v562_v2 = vpack.c.bf16 %v2308_v1, %v2308_v1 }
 0xd14   :  { %568 = vrot.lane.b32.xlu1 %v562_v2, %s2110_s0 }
 0xd86   :  { %v569_v5 = vpop.permute.xlu1 %568 }
 0xd87   :  { %1839 = vmatmul.mubr.msk.bf16.vlgmr.msra.gmra.mxu0 %vm188_vm2, %v569_v5 }
 0xd88   :  { %1854 = vmatprep.mubr.msk.bf16.mxu0 %vm2109_vm1, %v2108_v19 }
 0xe47   :  { %v619_v3 = vpop.f32.mrf.mxu0 }
 0xe48   :  { %v625_v7 = vadd.f32 %v619_v3, %v149_v6 }
 0xe49   :  { %v1840_v8 = vpop.f32.mrf.mxu0 }
 0xe4a   :  { %2019 = vtanh.f32 %v625_v7  ;;  %v1688_v12 = vmul.f32 -1.442695, %v625_v7 }
 0xe4b   :  { %v622_v9 = vpop.f32.mrf.mxu0 }
 0xe4c   :  { %2021 = vpow2.f32 %v1688_v12  ;;  %v1970_v12 = vld [vmem:[%s2562_s2] sm:$0xff]  }
 0xe4d   :  { %v1841_v10 = vpop.f32.mrf.mxu0 }
 0xe57   :  { %v2020_v11 = vpop.eup %2019 }
 0xe58   :  { %635 = vrot.lane.b32.xlu0 %v2020_v11, %s2107_s1  ;;  %v1969_v11 = vld [vmem:[%s2562_s2 + $0x8] sm:$0xff]  }
 0xe59   :  { %v2022_v14 = vpop.eup %2021  ;;  %1851 = vmatpush3.bf16.msra.mxu0 %v1969_v11 }
 0xe5a   :  { %v629_v15 = vadd.f32 1.0, %v2022_v14  ;;  %1852 = vmatprep.subr.bf16.mxu0 %v2108_v19 }
 0xe5c   :  { %2023 = vrcp.f32 %v629_v15  ;;  %v2392_v15 = vld [vmem:[%s2565_s5 + $0x8] sm:$0xff]  }
 0xe5d   :  { %1853 = vmatpush3.bf16.msra.mxu0 %v1970_v12 }
 0xe5e   :  { %1870 = vmatprep.subr.bf16.mxu0 %v2108_v19 }
 0xe69   :  { %v2024_v16 = vpop.eup %2023 }
 0xe6a   :  { %v633_v32 = vmul.f32 %v2024_v16, %v550_v60 }
 0xeca   :  { %v636_v17 = vpop.permute.xlu0 %635 }
 0xecb   :  { %v638_v18 = vmul.f32 %v2024_v16, %v636_v17 }
 0xecd   :  { %640 = vrot.lane.b32.xlu1 %v638_v18, %s2107_s1 }
 0xed1   :  { %185 = vrot.lane.b32.xlu1 %v2215_v24, %s2110_s0  ;;  %v1966_v24 = vld [vmem:[%s2562_s2] sm:$0xff]  }
 0xed2   :  { %1845 = vmatpush3.bf16.msra.mxu1 %v1966_v24  ;;  %v157_v24 = vadd.f32 %v2229_v31, %v2187_v4 }
 0xed5   :  { %372 = vrot.lane.b32.xlu1 %v2266_v13, %s2110_s0  ;;  %v1967_v13 = vld [vmem:[%s2563_s4 + $0x8] sm:$0xff]  }
 0xed6   :  { %1858 = vmatprep.subr.bf16.mxu1 %v1967_v13 }
 0xf3f   :  { %v641_v20 = vpop.permute.xlu1 %640 }
 0xf40   :  { %v2324_v21 = vadd.f32 %v641_v20, %v633_v32 }
 0xf42   :  { %2025 = vtanh.f32 %v2324_v21 }
 0xf43   :  { %v186_v22 = vpop.permute.xlu1 %185 }
 0xf44   :  { %189 = vst.msk [vmem:[#allocation2] sm:$0xff] %vm188_vm2, %v186_v22 }
 0xf47   :  { %v373_v23 = vpop.permute.xlu1 %372 }
 0xf48   :  { %375 = vst.msk [vmem:[#allocation2 + $0x10] sm:$0xff] %vm188_vm2, %v373_v23 }
 0xf4b   :  { %v841_v37 = vld [vmem:[#allocation2] sm:$0xff] }
 0xf4f   :  { %v2026_v26 = vpop.eup %2025  ;;  %v843_v41 = vld [vmem:[#allocation2 + $0x10] sm:$0xff] }
 0xf50   :  { %646 = vrot.lane.b32.xlu0 %v2026_v26, %s2107_s1 }
 0xf54   :  { %279 = vrot.lane.b32.xlu0 %v2245_v53, %s2110_s0  ;;  %v1968_v53 = vld [vmem:[%s2563_s4] sm:$0xff]  }
 0xf58   :  { %465 = vrot.lane.b32.xlu0 %v2287_v42, %s2110_s0 }
 0xfc2   :  { %v647_v28 = vpop.permute.xlu0 %646 }
 0xfc3   :  { %v2344_v33 = vmul.f32 %v2024_v16, %v647_v28  ;;  %v2399_v16 = vld [vmem:[%s2565_s5] sm:$0xff]  }
 0xfc5   :  { %v655_v34 = vpack.c.bf16 %v2344_v33, %v2344_v33 }
 0xfc6   :  { %v280_v35 = vpop.permute.xlu0 %279 }
 0xfc7   :  { %282 = vst.msk [vmem:[#allocation2 + $0x8] sm:$0xff] %vm188_vm2, %v280_v35  ;;  %661 = vrot.lane.b32.xlu1 %v655_v34, %s2110_s0 }
 0xfca   :  { %v466_v27 = vpop.permute.xlu0 %465 }
 0xfcb   :  { %468 = vst.msk [vmem:[#allocation2 + $0x18] sm:$0xff] %vm188_vm2, %v466_v27 }
 0xfce   :  { %v842_v36 = vld [vmem:[#allocation2 + $0x8] sm:$0xff] }
 0xfcf   :  { %v849_v39 = vpack.c.bf16 %v842_v36, %v841_v37 }
 0xfd2   :  { %v844_v40 = vld [vmem:[#allocation2 + $0x18] sm:$0xff] }
 0xfd3   :  { %v850_v42 = vpack.c.bf16 %v844_v40, %v843_v41 }
0x1039   :  { %v662_v38 = vpop.permute.xlu1 %661 }
0x103a   :  { %1847 = vmatmul.mubr.msk.bf16.vlgmr.msra.gmra.mxu1 %vm188_vm2, %v662_v38 }
0x103b   :  { %1859 = vmatpush3.bf16.msra.mxu1 %v1967_v13  ;;  %1862 = vmatprep.mubr.msk.bf16.mxu1 %vm188_vm2, %v849_v39 }
0x103c   :  { %1860 = vmatprep.subr.bf16.mxu1 %v1968_v53 }
0x103f   :  { %1861 = vmatpush3.bf16.msra.mxu1 %v1968_v53 }
0x1040   :  { %1886 = vmatprep.subr.bf16.mxu1 %v2108_v19 }
0x1042   :  { %1863 = vmatmul.mubr.msk.bf16.vlgmr.msra.gmra.mxu1 %vm188_vm2, %v850_v42 }
0x1043   :  { %1887 = vmatpush3.bf16.msra.mxu1 %v2392_v15 }
0x1044   :  { %1888 = vmatprep.subr.bf16.mxu1 %v2108_v19 }
0x1047   :  { %1889 = vmatpush3.bf16.msra.mxu1 %v2399_v16 }
0x1048   :  { %1902 = vmatprep.subr.bf16.mxu1 %v2108_v19 }
0x10fa   :  { %v712_v44 = vpop.f32.mrf.mxu1 }
0x10fb   :  { %v718_v45 = vadd.f32 %v712_v44, %v154_v43 }
0x10fc   :  { %v1848_v46 = vpop.f32.mrf.mxu1 }
0x10fd   :  { %2027 = vtanh.f32 %v718_v45  ;;  %v1692_v55 = vmul.f32 -1.442695, %v718_v45 }
0x10fe   :  { %v715_v47 = vpop.f32.mrf.mxu1 }
0x1100   :  { %v1849_v48 = vpop.f32.mrf.mxu1 }
0x1102   :  { %v2360_v49 = vpop.f32.mrf.mxu1 }
0x1104   :  { %v922_v51 = vpop.f32.mrf.mxu1 }
0x1105   :  { %v923_v52 = vadd.f32 %v2365_v50, %v922_v51 }
0x1106   :  { %v2425_v28 = vpop.f32.mrf.mxu1 }
0x1107   :  { %2029 = vtanh.f32 %v923_v52  ;;  %v1704_v56 = vmul.f32 -1.442695, %v923_v52 }
0x1108   :  { %2031 = vpow2.f32 %v1692_v55  ;;  %v925_v27 = vpop.f32.mrf.mxu1 }
0x1109   :  { %2033 = vpow2.f32 %v1704_v56  ;;  %v926_v37 = vadd.f32 %v2365_v50, %v925_v27 }
0x110a   :  { %v2028_v54 = vpop.eup %2027 }
0x110b   :  { %728 = vrot.lane.b32.xlu0 %v2028_v54, %s2107_s1 }
0x1114   :  { %v2030_v29 = vpop.eup %2029 }
0x1115   :  { %962 = vrot.lane.b32.xlu1 %v2030_v29, %s2107_s1  ;;  %v2032_v57 = vpop.eup %2031 }
0x1116   :  { %v722_v58 = vadd.f32 1.0, %v2032_v57  ;;  %v2034_v30 = vpop.eup %2033 }
0x1117   :  { %v956_v59 = vadd.f32 1.0, %v2034_v30 }
0x1118   :  { %2035 = vrcp.f32 %v722_v58 }
0x1119   :  { %2037 = vrcp.f32 %v956_v59 }
0x1125   :  { %v2036_v60 = vpop.eup %2035 }
0x1126   :  { %v2038_v63 = vpop.eup %2037  ;;  %v726_v5 = vmul.f32 %v2036_v60, %v2324_v21 }
0x1127   :  { %v960_v7 = vmul.f32 0.0, %v2038_v63 }
0x117d   :  { %v729_v61 = vpop.permute.xlu0 %728 }
0x117e   :  { %v731_v62 = vmul.f32 %v2036_v60, %v729_v61 }
0x1180   :  { %733 = vrot.lane.b32.xlu0 %v731_v62, %s2107_s1 }
0x1187   :  { %v963_v0 = vpop.permute.xlu1 %962 }
0x1188   :  { %v965_v2 = vmul.f32 %v2038_v63, %v963_v0 }
0x118a   :  { %967 = vrot.lane.b32.xlu1 %v965_v2, %s2107_s1 }
0x11f2   :  { %v734_v6 = vpop.permute.xlu0 %733 }
0x11f3   :  { %v2373_v3 = vadd.f32 %v734_v6, %v726_v5 }
0x11f5   :  { %2039 = vtanh.f32 %v2373_v3 }
0x11fc   :  { %v968_v8 = vpop.permute.xlu1 %967 }
0x11fd   :  { %v2376_v9 = vadd.f32 %v968_v8, %v960_v7  ;;  %v931_v8 = vadd.f32 %v2360_v49, %v2365_v50 }
0x11ff   :  { %2041 = vtanh.f32 %v2376_v9 }
0x1202   :  { %v2040_v10 = vpop.eup %2039 }
0x1203   :  { %739 = vrot.lane.b32.xlu0 %v2040_v10, %s2107_s1 }
0x120c   :  { %v2042_v14 = vpop.eup %2041 }
0x120d   :  { %973 = vrot.lane.b32.xlu1 %v2042_v14, %s2107_s1 }
0x1275   :  { %v740_v17 = vpop.permute.xlu0 %739 }
0x1276   :  { %v2403_v18 = vmul.f32 %v2036_v60, %v740_v17 }
0x1278   :  { %v748_v32 = vpack.c.bf16 %v2403_v18, %v2403_v18 }
0x127a   :  { %754 = vrot.lane.b32.xlu0 %v748_v32, %s2110_s0 }
0x127f   :  { %v974_v20 = vpop.permute.xlu1 %973 }
0x1280   :  { %v976_v21 = vmul.f32 %v2038_v63, %v974_v20 }
0x1282   :  { %v977_v22 = vpack.c.bf16 %v976_v21, %v976_v21 }
0x1284   :  { %983 = vrot.lane.b32.xlu1 %v977_v22, %s2110_s0 }
0x12ec   :  { %v755_v23 = vpop.permute.xlu0 %754 }
0x12ed   :  { %1855 = vmatmul.mubr.msk.bf16.vlgmr.msra.gmra.mxu0 %vm188_vm2, %v755_v23 }
0x12ee   :  { %1871 = vmatpush3.bf16.msra.mxu0 %v2392_v15  ;;  %1874 = vmatprep.mubr.msk.bf16.mxu0 %vm2109_vm1, %v2108_v19 }
0x12ef   :  { %1872 = vmatprep.subr.bf16.mxu0 %v2108_v19 }
0x12f2   :  { %1873 = vmatpush3.bf16.msra.mxu0 %v2399_v16 }
0x12f3   :  { %1878 = vmatprep.subr.bf16.mxu0 %v2108_v19 }
0x12f6   :  { %v984_v25 = vpop.permute.xlu1 %983 }
0x12f7   :  { %1875 = vmatmul.mubr.msk.bf16.vlgmr.msra.gmra.mxu0 %vm188_vm2, %v984_v25 }
0x12f8   :  { %1879 = vmatpush3.bf16.msra.mxu0 %v2392_v15  ;;  %1882 = vmatprep.mubr.msk.bf16.mxu0 %vm2109_vm1, %v2108_v19 }
0x12f9   :  { %1880 = vmatprep.subr.bf16.mxu0 %v2108_v19 }
0x12fc   :  { %1881 = vmatpush3.bf16.msra.mxu0 %v2399_v16 }
0x12fd   :  { %1894 = vmatprep.subr.bf16.mxu0 %v2108_v19 }
0x13ad   :  { %v805_v13 = vpop.f32.mrf.mxu0 }
0x13ae   :  { %v811_v26 = vadd.f32 %v805_v13, %v157_v24 }
0x13af   :  { %v1856_v34 = vpop.f32.mrf.mxu0 }
0x13b0   :  { %v1696_v29 = vmul.f32 -1.442695, %v811_v26 }
0x13b1   :  { %v808_v35 = vpop.f32.mrf.mxu0 }
0x13b3   :  { %v1857_v36 = vpop.f32.mrf.mxu0 }
0x13b7   :  { %v1034_v53 = vpop.f32.mrf.mxu0 }
0x13b8   :  { %v1040_v38 = vadd.f32 %v1034_v53, %v926_v37 }
0x13b9   :  { %v1876_v39 = vpop.f32.mrf.mxu0 }
0x13ba   :  { %2043 = vtanh.f32 %v1040_v38  ;;  %v1708_v4 = vmul.f32 -1.442695, %v1040_v38 }
0x13bb   :  { %v1037_v40 = vpop.f32.mrf.mxu0 }
0x13bc   :  { %2045 = vpow2.f32 %v1708_v4 }
0x13bd   :  { %v1877_v41 = vpop.f32.mrf.mxu0 }
0x13c7   :  { %v2044_v42 = vpop.eup %2043 }
0x13c8   :  { %1050 = vrot.lane.b32.xlu0 %v2044_v42, %s2107_s1 }
0x13c9   :  { %v2046_v31 = vpop.eup %2045 }
0x13ca   :  { %v1044_v43 = vadd.f32 1.0, %v2046_v31 }
0x13cc   :  { %2047 = vrcp.f32 %v1044_v43 }
0x13d9   :  { %v2048_v44 = vpop.eup %2047 }
0x13da   :  { %v1048_v47 = vmul.f32 %v2048_v44, %v2376_v9 }
0x143a   :  { %v1051_v45 = vpop.permute.xlu0 %1050 }
0x143b   :  { %v1053_v46 = vmul.f32 %v2048_v44, %v1051_v45 }
0x143d   :  { %1055 = vrot.lane.b32.xlu1 %v1053_v46, %s2107_s1 }
0x14af   :  { %v1056_v48 = vpop.permute.xlu1 %1055 }
0x14b0   :  { %v1058_v51 = vadd.f32 %v1056_v48, %v1048_v47 }
0x14b2   :  { %2049 = vtanh.f32 %v1058_v51 }
0x14b3   :  { %2051 = vtanh.f32 %v811_v26 }
0x14b4   :  { %2053 = vpow2.f32 %v1696_v29 }
0x14bf   :  { %v2050_v52 = vpop.eup %2049 }
0x14c0   :  { %1061 = vrot.lane.b32.xlu0 %v2050_v52, %s2107_s1  ;;  %v2052_v54 = vpop.eup %2051 }
0x14c1   :  { %v2054_v55 = vpop.eup %2053 }
0x14c2   :  { %v815_v56 = vadd.f32 1.0, %v2054_v55 }
0x14c4   :  { %821 = vrot.lane.b32.xlu0 %v2052_v54, %s2107_s1  ;;  %2055 = vrcp.f32 %v815_v56 }
0x14d1   :  { %v2056_v59 = vpop.eup %2055 }
0x14d2   :  { %v819_v63 = vmul.f32 %v2056_v59, %v2373_v3 }
0x1532   :  { %v1062_v57 = vpop.permute.xlu0 %1061 }
0x1533   :  { %v1064_v58 = vmul.f32 %v2048_v44, %v1062_v57  ;;  %v934_v44 = vadd.f32 %v2425_v28, %v2365_v50 }
0x1535   :  { %v1065_v30 = vpack.c.bf16 %v1064_v58, %v1064_v58 }
0x1536   :  { %v822_v60 = vpop.permute.xlu0 %821 }
0x1537   :  { %v824_v61 = vmul.f32 %v2056_v59, %v822_v60  ;;  %1067 = vrot.lane.b32.xlu1 %v1065_v30, %s2110_s0 }
0x1539   :  { %826 = vrot.lane.b32.xlu0 %v824_v61, %s2107_s1 }
0x15a9   :  { %v1068_v62 = vpop.permute.xlu1 %1067 }
0x15aa   :  { %1883 = vmatmul.mubr.msk.bf16.vlgmr.msra.gmra.mxu0 %vm188_vm2, %v1068_v62 }
0x15ab   :  { %v827_v0 = vpop.permute.xlu0 %826  ;;  %1895 = vmatpush3.bf16.msra.mxu0 %v2392_v15  ;;  %1898 = vmatprep.mubr.msk.bf16.mxu0 %vm2109_vm1, %v2108_v19 }
0x15ac   :  { %v829_v2 = vadd.f32 %v827_v0, %v819_v63  ;;  %1896 = vmatprep.subr.bf16.mxu0 %v2108_v19 }
0x15ae   :  { %2057 = vtanh.f32 %v829_v2 }
0x15af   :  { %1897 = vmatpush3.bf16.msra.mxu0 %v2399_v16 }
0x15b0   :  { %1910 = vmatprep.subr.bf16.mxu0 %v2108_v19 }
0x15bb   :  { %v2058_v5 = vpop.eup %2057 }
0x15bc   :  { %832 = vrot.lane.b32.xlu0 %v2058_v5, %s2107_s1 }
0x15c0   :  { %558 = vrot.lane.b32.xlu0 %v2308_v1, %s2110_s0 }
0x15c4   :  { %744 = vrot.lane.b32.xlu0 %v2403_v18, %s2110_s0 }
0x162e   :  { %v833_v6 = vpop.permute.xlu0 %832 }
0x162f   :  { %v835_v13 = vmul.f32 %v2056_v59, %v833_v6 }
0x1632   :  { %v559_v3 = vpop.permute.xlu0 %558 }
0x1633   :  { %561 = vst.msk [vmem:[#allocation2 + $0x20] sm:$0xff] %vm188_vm2, %v559_v3 }
0x1636   :  { %v745_v7 = vpop.permute.xlu0 %744 }
0x1637   :  { %747 = vst.msk [vmem:[#allocation2 + $0x30] sm:$0xff] %vm188_vm2, %v745_v7 }
0x163a   :  { %v845_v37 = vld [vmem:[#allocation2 + $0x20] sm:$0xff] }
0x166a   :  { %v1106_v9 = vpop.f32.mrf.mxu0 }
0x166b   :  { %v1112_v10 = vadd.f32 %v1106_v9, %v931_v8 }
0x166c   :  { %v1884_v11 = vpop.f32.mrf.mxu0 }
0x166d   :  { %2059 = vtanh.f32 %v1112_v10  ;;  %v1710_v17 = vmul.f32 -1.442695, %v1112_v10 }
0x166e   :  { %v1109_v12 = vpop.f32.mrf.mxu0 }
0x166f   :  { %2061 = vpow2.f32 %v1710_v17 }
0x1670   :  { %v1885_v14 = vpop.f32.mrf.mxu0 }
0x167a   :  { %v2060_v1 = vpop.eup %2059 }
0x167b   :  { %1122 = vrot.lane.b32.xlu1 %v2060_v1, %s2107_s1 }
0x167c   :  { %v2062_v18 = vpop.eup %2061 }
0x167d   :  { %v1116_v32 = vadd.f32 1.0, %v2062_v18 }
0x167f   :  { %2063 = vrcp.f32 %v1116_v32 }
0x168c   :  { %v2064_v20 = vpop.eup %2063 }
0x168d   :  { %v1120_v49 = vmul.f32 %v2064_v20, %v1058_v51 }
0x16ed   :  { %v1123_v21 = vpop.permute.xlu1 %1122 }
0x16ee   :  { %v1125_v22 = vmul.f32 %v2064_v20, %v1123_v21 }
0x16f0   :  { %1127 = vrot.lane.b32.xlu1 %v1125_v22, %s2107_s1 }
0x1762   :  { %v1128_v23 = vpop.permute.xlu1 %1127 }
0x1763   :  { %v1130_v25 = vadd.f32 %v1128_v23, %v1120_v49 }
0x1765   :  { %2065 = vtanh.f32 %v1130_v25 }
0x1772   :  { %v2066_v24 = vpop.eup %2065 }
0x1773   :  { %1133 = vrot.lane.b32.xlu1 %v2066_v24, %s2107_s1 }
0x1777   :  { %651 = vrot.lane.b32.xlu1 %v2344_v33, %s2110_s0  ;;  %v847_v33 = vld [vmem:[#allocation2 + $0x30] sm:$0xff] }
0x177b   :  { %837 = vrot.lane.b32.xlu1 %v835_v13, %s2110_s0 }
0x17e5   :  { %v1134_v26 = vpop.permute.xlu1 %1133 }
0x17e6   :  { %v1136_v34 = vmul.f32 %v2064_v20, %v1134_v26 }
0x17e8   :  { %v1137_v35 = vpack.c.bf16 %v1136_v34, %v1136_v34 }
0x17e9   :  { %v652_v27 = vpop.permute.xlu1 %651 }
0x17ea   :  { %654 = vst.msk [vmem:[#allocation2 + $0x28] sm:$0xff] %vm188_vm2, %v652_v27  ;;  %1139 = vrot.lane.b32.xlu0 %v1137_v35, %s2110_s0 }
0x17ed   :  { %v838_v36 = vpop.permute.xlu1 %837 }
0x17ee   :  { %840 = vst.msk [vmem:[#allocation2 + $0x38] sm:$0xff] %vm188_vm2, %v838_v36 }
0x17f1   :  { %v846_v53 = vld [vmem:[#allocation2 + $0x28] sm:$0xff] }
0x17f2   :  { %v851_v38 = vpack.c.bf16 %v846_v53, %v845_v37 }
0x17f4   :  { %1866 = vmatprep.mubr.msk.bf16.mxu1 %vm188_vm2, %v851_v38 }
0x17f5   :  { %v848_v39 = vld [vmem:[#allocation2 + $0x38] sm:$0xff] }
0x17f6   :  { %v852_v40 = vpack.c.bf16 %v848_v39, %v847_v33 }
0x17f8   :  { %1867 = vmatmul.mubr.msk.bf16.gmra.mxu1 %vm188_vm2, %v852_v40 }
0x17f9   :  { %1890 = vmatprep.mubr.msk.bf16.mxu1 %vm2109_vm1, %v2108_v19 }
0x185c   :  { %v1140_v41 = vpop.permute.xlu0 %1139 }
0x185d   :  { %1891 = vmatmul.mubr.msk.bf16.vlgmr.msra.gmra.mxu1 %vm188_vm2, %v1140_v41 }
0x185e   :  { %1903 = vmatpush3.bf16.msra.mxu1 %v2392_v15  ;;  %1906 = vmatprep.mubr.msk.bf16.mxu1 %vm2109_vm1, %v2108_v19 }
0x185f   :  { %1904 = vmatprep.subr.bf16.mxu1 %v2108_v19 }
0x1862   :  { %1905 = vmatpush3.bf16.msra.mxu1 %v2399_v16 }
0x1863   :  { %1918 = vmatprep.subr.bf16.mxu1 %v2108_v19 }
0x18b8   :  { %v2472_v42 = vpop.f32.mrf.mxu1 }
0x18ba   :  { %v938_v4 = vpop.f32.mrf.mxu1 }
0x18bb   :  { %v939_v2 = vadd.f32 %v2365_v50, %v938_v4 }
0x18bc   :  { %v2474_v31 = vpop.f32.mrf.mxu1 }
0x18be   :  { %v2476_v43 = vpop.f32.mrf.mxu1 }
0x18bf   :  { %v942_v24 = vadd.f32 %v2365_v50, %v2476_v43 }
0x191d   :  { %v1178_v45 = vpop.f32.mrf.mxu1 }
0x191e   :  { %v1184_v46 = vadd.f32 %v1178_v45, %v934_v44 }
0x191f   :  { %v1892_v47 = vpop.f32.mrf.mxu1 }
0x1920   :  { %2067 = vtanh.f32 %v1184_v46  ;;  %v1712_v54 = vmul.f32 -1.442695, %v1184_v46  ;;  %v947_v47 = vadd.f32 %v2472_v42, %v2365_v50 }
0x1921   :  { %v1181_v48 = vpop.f32.mrf.mxu1 }
0x1922   :  { %2069 = vpow2.f32 %v1712_v54 }
0x1923   :  { %v1893_v51 = vpop.f32.mrf.mxu1 }
0x192d   :  { %v2068_v52 = vpop.eup %2067 }
0x192e   :  { %1194 = vrot.lane.b32.xlu1 %v2068_v52, %s2107_s1 }
0x192f   :  { %v2070_v29 = vpop.eup %2069 }
0x1930   :  { %v1188_v55 = vadd.f32 1.0, %v2070_v29 }
0x1932   :  { %2071 = vrcp.f32 %v1188_v55 }
0x193f   :  { %v2072_v56 = vpop.eup %2071 }
0x1940   :  { %v1192_v28 = vmul.f32 %v2072_v56, %v1130_v25 }
0x19a0   :  { %v1195_v57 = vpop.permute.xlu1 %1194 }
0x19a1   :  { %v1197_v58 = vmul.f32 %v2072_v56, %v1195_v57 }
0x19a3   :  { %1199 = vrot.lane.b32.xlu0 %v1197_v58, %s2107_s1 }
0x1a15   :  { %v1200_v30 = vpop.permute.xlu0 %1199 }
0x1a16   :  { %v1202_v59 = vadd.f32 %v1200_v30, %v1192_v28 }
0x1a18   :  { %2073 = vtanh.f32 %v1202_v59 }
0x1a25   :  { %v2074_v60 = vpop.eup %2073 }
0x1a26   :  { %1205 = vrot.lane.b32.xlu1 %v2074_v60, %s2107_s1 }
0x1a98   :  { %v1206_v61 = vpop.permute.xlu1 %1205 }
0x1a99   :  { %v1208_v62 = vmul.f32 %v2072_v56, %v1206_v61 }
0x1a9b   :  { %v1209_v63 = vpack.c.bf16 %v1208_v62, %v1208_v62 }
0x1a9d   :  { %1211 = vrot.lane.b32.xlu0 %v1209_v63, %s2110_s0 }
0x1b0f   :  { %v1212_v0 = vpop.permute.xlu0 %1211 }
0x1b10   :  { %1899 = vmatmul.mubr.msk.bf16.vlgmr.msra.gmra.mxu0 %vm188_vm2, %v1212_v0 }
0x1b11   :  { %1911 = vmatpush3.bf16.msra.mxu0 %v2392_v15  ;;  %1914 = vmatprep.mubr.msk.bf16.mxu0 %vm2109_vm1, %v2108_v19 }
0x1b12   :  { %1912 = vmatprep.subr.bf16.mxu0 %v2108_v19 }
0x1b15   :  { %1913 = vmatpush3.bf16.msra.mxu0 %v2399_v16 }
0x1b16   :  { %1926 = vmatprep.subr.bf16.mxu0 %v2108_v19 }
0x1bd0   :  { %v1250_v5 = vpop.f32.mrf.mxu0 }
0x1bd1   :  { %v1256_v6 = vadd.f32 %v1250_v5, %v939_v2 }
0x1bd2   :  { %v1900_v3 = vpop.f32.mrf.mxu0 }
0x1bd3   :  { %2075 = vtanh.f32 %v1256_v6  ;;  %v1714_v10 = vmul.f32 -1.442695, %v1256_v6  ;;  %v950_v6 = vadd.f32 %v2474_v31, %v2365_v50 }
0x1bd4   :  { %v1253_v7 = vpop.f32.mrf.mxu0 }
0x1bd5   :  { %2077 = vpow2.f32 %v1714_v10 }
0x1bd6   :  { %v1901_v8 = vpop.f32.mrf.mxu0 }
0x1be0   :  { %v2076_v9 = vpop.eup %2075 }
0x1be1   :  { %1266 = vrot.lane.b32.xlu1 %v2076_v9, %s2107_s1 }
0x1be2   :  { %v2078_v11 = vpop.eup %2077 }
0x1be3   :  { %v1260_v12 = vadd.f32 1.0, %v2078_v11 }
0x1be5   :  { %2079 = vrcp.f32 %v1260_v12 }
0x1bf2   :  { %v2080_v14 = vpop.eup %2079 }
0x1bf3   :  { %v1264_v18 = vmul.f32 %v2080_v14, %v1202_v59 }
0x1c53   :  { %v1267_v1 = vpop.permute.xlu1 %1266 }
0x1c54   :  { %v1269_v17 = vmul.f32 %v2080_v14, %v1267_v1 }
0x1c56   :  { %1271 = vrot.lane.b32.xlu0 %v1269_v17, %s2107_s1 }
0x1cc8   :  { %v1272_v32 = vpop.permute.xlu0 %1271 }
0x1cc9   :  { %v1274_v20 = vadd.f32 %v1272_v32, %v1264_v18 }
0x1ccb   :  { %2081 = vtanh.f32 %v1274_v20 }
0x1cd8   :  { %v2082_v21 = vpop.eup %2081 }
0x1cd9   :  { %1277 = vrot.lane.b32.xlu1 %v2082_v21, %s2107_s1  ;;  %v1973_v21 = vld [vmem:[%s2566_s7 + $0x8] sm:$0xff]  }
0x1d4b   :  { %v1278_v22 = vpop.permute.xlu1 %1277 }
0x1d4c   :  { %v1280_v49 = vmul.f32 %v2080_v14, %v1278_v22  ;;  %v1974_v22 = vld [vmem:[%s2566_s7] sm:$0xff]  }
0x1d4e   :  { %v1281_v23 = vpack.c.bf16 %v1280_v49, %v1280_v49 }
0x1d50   :  { %1283 = vrot.lane.b32.xlu0 %v1281_v23, %s2110_s0  ;;  %v1975_v23 = vld [vmem:[%s2567_s9 + $0x18] sm:$0xff]  }
0x1dc2   :  { %v1284_v25 = vpop.permute.xlu0 %1283 }
0x1dc3   :  { %1907 = vmatmul.mubr.msk.bf16.vlgmr.msra.gmra.mxu1 %vm188_vm2, %v1284_v25  ;;  %v1976_v25 = vld [vmem:[%s2567_s9 + $0x10] sm:$0xff]  }
0x1dc4   :  { %1919 = vmatpush3.bf16.msra.mxu1 %v2392_v15  ;;  %1922 = vmatprep.mubr.msk.bf16.mxu1 %vm2109_vm1, %v2108_v19 }
0x1dc5   :  { %1920 = vmatprep.subr.bf16.mxu1 %v2108_v19 }
0x1dc8   :  { %1921 = vmatpush3.bf16.msra.mxu1 %v2399_v16 }
0x1dc9   :  { %1934 = vmatprep.subr.bf16.mxu1 %v2108_v19 }
0x1e83   :  { %v1322_v13 = vpop.f32.mrf.mxu1 }
0x1e84   :  { %v1328_v26 = vadd.f32 %v1322_v13, %v942_v24 }
0x1e85   :  { %v1908_v34 = vpop.f32.mrf.mxu1 }
0x1e86   :  { %2083 = vtanh.f32 %v1328_v26  ;;  %v1716_v15 = vmul.f32 -1.442695, %v1328_v26 }
0x1e87   :  { %v1325_v35 = vpop.f32.mrf.mxu1 }
0x1e88   :  { %2085 = vpow2.f32 %v1716_v15  ;;  %v1977_v35 = vld [vmem:[%s2567_s9 + $0x8] sm:$0xff]  }
0x1e89   :  { %v1909_v27 = vpop.f32.mrf.mxu1 }
0x1e8a   :  { %v1978_v27 = vld [vmem:[%s2567_s9] sm:$0xff]  }
0x1e93   :  { %v2084_v36 = vpop.eup %2083 }
0x1e94   :  { %1338 = vrot.lane.b32.xlu1 %v2084_v36, %s2107_s1  ;;  %v1721_v36 = vld [vmem:[%s2568_s8] ss:$0 sm:$0xff] }
0x1e95   :  { %v2086_v37 = vpop.eup %2085 }
0x1e96   :  { %v1332_v53 = vadd.f32 1.0, %v2086_v37 }
0x1e98   :  { %2087 = vrcp.f32 %v1332_v53 }
0x1ea5   :  { %v2088_v16 = vpop.eup %2087 }
0x1ea6   :  { %v1336_v39 = vmul.f32 %v2088_v16, %v1274_v20 }
0x1f06   :  { %v1339_v38 = vpop.permute.xlu1 %1338 }
0x1f07   :  { %v1341_v33 = vmul.f32 %v2088_v16, %v1339_v38 }
0x1f09   :  { %1343 = vrot.lane.b32.xlu0 %v1341_v33, %s2107_s1 }
0x1f7b   :  { %v1344_v40 = vpop.permute.xlu0 %1343 }
0x1f7c   :  { %v1346_v41 = vadd.f32 %v1344_v40, %v1336_v39 }
0x1f7e   :  { %2089 = vtanh.f32 %v1346_v41 }
0x1f8b   :  { %v2090_v4 = vpop.eup %2089 }
0x1f8c   :  { %1349 = vrot.lane.b32.xlu1 %v2090_v4, %s2107_s1 }
0x1ffe   :  { %v1350_v43 = vpop.permute.xlu1 %1349 }
0x1fff   :  { %v1352_v44 = vmul.f32 %v2088_v16, %v1350_v43 }
0x2001   :  { %v1353_v45 = vpack.c.bf16 %v1352_v44, %v1352_v44 }
0x2003   :  { %1355 = vrot.lane.b32.xlu0 %v1353_v45, %s2110_s0 }
0x2075   :  { %v1356_v46 = vpop.permute.xlu0 %1355 }
0x2076   :  { %1915 = vmatmul.mubr.msk.bf16.vlgmr.msra.gmra.mxu0 %vm188_vm2, %v1356_v46 }
0x2077   :  { %1930 = vmatprep.mubr.msk.bf16.mxu0 %vm2109_vm1, %v2108_v19  ;;  %1927 = vmatpush3.bf16.msra.mxu0 %v1973_v21 }
0x2078   :  { %1928 = vmatprep.subr.bf16.mxu0 %v2108_v19 }
0x207b   :  { %1929 = vmatpush3.bf16.msra.mxu0 %v1974_v22 }
0x2136   :  { %v1394_v48 = vpop.f32.mrf.mxu0 }
0x2137   :  { %v1400_v51 = vadd.f32 %v1394_v48, %v947_v47 }
0x2138   :  { %v1916_v52 = vpop.f32.mrf.mxu0 }
0x2139   :  { %2091 = vtanh.f32 %v1400_v51  ;;  %v1718_v56 = vmul.f32 -1.442695, %v1400_v51 }
0x213a   :  { %v1397_v54 = vpop.f32.mrf.mxu0 }
0x213b   :  { %2093 = vpow2.f32 %v1718_v56 }
0x213c   :  { %v1917_v29 = vpop.f32.mrf.mxu0 }
0x2146   :  { %v2092_v55 = vpop.eup %2091 }
0x2147   :  { %1410 = vrot.lane.b32.xlu1 %v2092_v55, %s2107_s1 }
0x2148   :  { %v2094_v57 = vpop.eup %2093 }
0x2149   :  { %v1404_v58 = vadd.f32 1.0, %v2094_v57 }
0x214b   :  { %2095 = vrcp.f32 %v1404_v58 }
0x2158   :  { %v2096_v28 = vpop.eup %2095 }
0x2159   :  { %v1408_v42 = vmul.f32 %v2096_v28, %v1346_v41 }
0x21b9   :  { %v1411_v30 = vpop.permute.xlu1 %1410 }
0x21ba   :  { %v1413_v59 = vmul.f32 %v2096_v28, %v1411_v30 }
0x21bc   :  { %1415 = vrot.lane.b32.xlu0 %v1413_v59, %s2107_s1 }
0x222e   :  { %v1416_v60 = vpop.permute.xlu0 %1415 }
0x222f   :  { %v1418_v61 = vadd.f32 %v1416_v60, %v1408_v42 }
0x2231   :  { %2097 = vtanh.f32 %v1418_v61 }
0x223e   :  { %v2098_v62 = vpop.eup %2097 }
0x223f   :  { %1421 = vrot.lane.b32.xlu1 %v2098_v62, %s2107_s1 }
0x22b1   :  { %v1422_v63 = vpop.permute.xlu1 %1421 }
0x22b2   :  { %v1424_v0 = vmul.f32 %v2096_v28, %v1422_v63 }
0x22b4   :  { %v1425_v2 = vpack.c.bf16 %v1424_v0, %v1424_v0 }
0x22b6   :  { %1427 = vrot.lane.b32.xlu0 %v1425_v2, %s2110_s0 }
0x2328   :  { %v1428_v5 = vpop.permute.xlu0 %1427 }
0x2329   :  { %1923 = vmatmul.mubr.msk.bf16.vlgmr.msra.gmra.mxu1 %vm188_vm2, %v1428_v5 }
0x232a   :  { %1942 = vmatprep.mubr.msk.bf16.mxu1 %vm2109_vm1, %v2108_v19  ;;  %1935 = vmatpush3.bf16.msra.mxu1 %v1975_v23 }
0x232b   :  { %1936 = vmatprep.subr.bf16.mxu1 %v2108_v19 }
0x232e   :  { %1937 = vmatpush3.bf16.msra.mxu1 %v1976_v25 }
0x232f   :  { %1938 = vmatprep.subr.bf16.mxu1 %v2108_v19 }
0x2332   :  { %1939 = vmatpush3.bf16.msra.mxu1 %v1977_v35 }
0x2333   :  { %1940 = vmatprep.subr.bf16.mxu1 %v2108_v19  ;;  %v1725_v19 = vld [vmem:[%s2569_s10] ss:$0 sm:$0xff] }
0x2336   :  { %1941 = vmatpush3.bf16.msra.mxu1 %v1978_v27 }
0x23e9   :  { %v1466_v3 = vpop.f32.mrf.mxu1 }
0x23ea   :  { %v1472_v7 = vadd.f32 %v1466_v3, %v950_v6 }
0x23eb   :  { %v1924_v8 = vpop.f32.mrf.mxu1 }
0x23ec   :  { %2099 = vtanh.f32 %v1472_v7  ;;  %v1720_v12 = vmul.f32 -1.442695, %v1472_v7 }
0x23ed   :  { %v1469_v9 = vpop.f32.mrf.mxu1 }
0x23ee   :  { %2101 = vpow2.f32 %v1720_v12 }
0x23ef   :  { %v1925_v10 = vpop.f32.mrf.mxu1 }
0x23f9   :  { %v2100_v11 = vpop.eup %2099 }
0x23fa   :  { %1482 = vrot.lane.b32.xlu1 %v2100_v11, %s2107_s1 }
0x23fb   :  { %v2102_v14 = vpop.eup %2101 }
0x23fc   :  { %v1476_v1 = vadd.f32 1.0, %v2102_v14 }
0x23fe   :  { %2103 = vrcp.f32 %v1476_v1 }
0x240b   :  { %v2104_v17 = vpop.eup %2103 }
0x240c   :  { %v1480_v50 = vmul.f32 %v2104_v17, %v1418_v61 }
0x246c   :  { %v1483_v18 = vpop.permute.xlu1 %1482 }
0x246d   :  { %v1485_v32 = vmul.f32 %v2104_v17, %v1483_v18 }
0x246f   :  { %1487 = vrot.lane.b32.xlu0 %v1485_v32, %s2107_s1 }
0x24e1   :  { %v1488_v31 = vpop.permute.xlu0 %1487 }
0x24e2   :  { %v1490_v20 = vadd.f32 %v1488_v31, %v1480_v50 }
0x24e4   :  { %2105 = vtanh.f32 %v1490_v20 }
0x24f1   :  { %v2106_v49 = vpop.eup %2105 }
0x24f2   :  { %1493 = vrot.lane.b32.xlu1 %v2106_v49, %s2107_s1 }
0x2564   :  { %v1494_v24 = vpop.permute.xlu1 %1493 }
0x2565   :  { %v1496_v13 = vmul.f32 %v2104_v17, %v1494_v24 }
0x2567   :  { %v1497_v26 = vpack.c.bf16 %v1496_v13, %v1496_v13 }
0x2569   :  { %1510 = vrot.lane.b32.xlu0 %v1497_v26, %s2110_s0 }
0x25db   :  { %v1511_v34 = vpop.permute.xlu0 %1510 }
0x25dc   :  { %1931 = vmatmul.mubr.msk.bf16.vlgmr.msra.gmra.mxu0 %vm188_vm2, %v1511_v34 }
0x269c   :  { %v1561_v15 = vpop.f32.mrf.mxu0 }
0x269d   :  { %v1562_v37 = vadd.f32 %v1721_v36, %v1561_v15 }
0x269e   :  { %v1932_v53 = vpop.f32.mrf.mxu0 }
0x269f   :  { %v1567_v16 = vmax.f32 %v1562_v37, 0.0 }
0x26a0   :  { %v1564_v38 = vpop.f32.mrf.mxu0 }
0x26a1   :  { %v1568_v33 = vpack.c.bf16 %v1567_v16, %v1567_v16 }
0x26a2   :  { %v1933_v39 = vpop.f32.mrf.mxu0 }
0x26a3   :  { %1943 = vmatmul.mubr.msk.bf16.vlgmr.msra.gmra.mxu1 %vm1608_vm3, %v1568_v33 }
0x2763   :  { %v1646_v40 = vpop.f32.mrf.mxu1 }
0x2764   :  { %v1647_v41 = vadd.f32 %v1725_v19, %v1646_v40 }
0x2765   :  { %v1944_v4 = vpop.f32.mrf.mxu1 }
0x2766   :  { %1653 = vst.msk [vmem:[%s2570_s11] sm:$0xff] %vm1652_vm4, %v1647_v41 }
0x2767   :  { %v1649_v43 = vpop.f32.mrf.mxu1 }
0x2769   :  { %v1945_v44 = vpop.f32.mrf.mxu1 }

</bundles_post_ra>
